<compile_context>
chip_gen: v7x
topology: tpu7x:2x2x1
jax: 0.10.0
libtpu: 0.0.40
codegen_flags: <defaults>
</compile_context>

<pallas_src>
import jax
import jax.numpy as jnp
from jax.experimental import pallas as pl
from jax.experimental.pallas import tpu as pltpu

_MIB = 1024 * 1024


def _round_up(n, m):
    return ((n + m - 1) // m) * m


def _cdiv(a, b):
    return (a + b - 1) // b


def dense_network_kernel(x_ref, w1_ref, b1_ref, w2_ref, b2_ref, w3_ref, b3_ref, o_ref):
    x = x_ref[...]  # (tile_b, k_pad) bf16

    # fc1 + ReLU (bf16 MXU matmul, f32 accumulate; bias/ReLU in f32)
    h1 = jnp.dot(x, w1_ref[...], preferred_element_type=jnp.float32) + b1_ref[...]
    h1 = jnp.maximum(h1, 0.0).astype(jnp.bfloat16)
    # drop1: identity (eval mode)

    # fc2 + ReLU
    h2 = jnp.dot(h1, w2_ref[...], preferred_element_type=jnp.float32) + b2_ref[...]
    h2 = jnp.maximum(h2, 0.0).astype(jnp.bfloat16)
    # drop2: identity (eval mode)

    # prediction + log_softmax over classes (dim=1).
    # Pad classes carry bias -1e30 (finite), so exp(shifted) -> 0 for them and the
    # log-sum-exp equals the unpadded computation.
    z = jnp.dot(h2, w3_ref[...], preferred_element_type=jnp.float32) + b3_ref[...]
    m = jnp.max(z, axis=1, keepdims=True)
    shifted = z - m
    lse = jnp.log(jnp.sum(jnp.exp(shifted), axis=1, keepdims=True))
    o_ref[...] = shifted - lse


def _vmem_capacity_bytes():
    try:
        cap = getattr(pltpu.get_tpu_info(), "vmem_capacity_bytes", None)
        if cap:
            return int(cap)
    except Exception:
        pass
    return 64 * _MIB  # conservative (v7x-sized) fallback


def _vmem_estimate(tile_b, k_pad, h1, h2, c_pad):
    """Rough per-step VMEM working set (bytes): double-buffered x/out, resident weights."""
    bf16, f32 = 2, 4
    x_bufs = 2 * tile_b * k_pad * bf16
    out_bufs = 2 * tile_b * c_pad * f32
    weights = (k_pad * h1 + h1 * h2 + h2 * c_pad) * bf16
    biases = (h1 + h2 + c_pad) * f32
    interm = tile_b * (h1 + h2) * (f32 + bf16) + 2 * tile_b * c_pad * f32
    return x_bufs + out_bufs + weights + biases + interm


def _choose_batch_tiling(batch, k_pad, h1, h2, c_pad, max_tile_b, vmem_budget):
    """Pick (tile_b, padded_batch) with >=2 grid steps (v7x megacore), small batch-pad
    waste, and a working set under vmem_budget (shrinks tile_b for huge vocabularies)."""
    b8 = _round_up(batch, 8)
    min_tiles = 2 if b8 > 8 else 1
    num_tiles = max(min_tiles, _cdiv(b8, max_tile_b))
    tile_b = _round_up(_cdiv(b8, num_tiles), 8)
    while tile_b > 8 and _vmem_estimate(tile_b, k_pad, h1, h2, c_pad) > vmem_budget:
        tile_b = _round_up(tile_b // 2, 8)
    padded_batch = _cdiv(b8, tile_b) * tile_b
    return tile_b, padded_batch


def dense_network_forward(x, params):
    """x: (batch, n_features) float/int. Returns (batch, n_classes) f32 log-probs."""
    w1, b1, w2, b2, w3, b3 = params
    batch, n_features = x.shape
    h1_dim, h2_dim = w1.shape[1], w2.shape[1]
    n_classes = w3.shape[1]

    # MXU-granular contraction dim for fc1; lane-dense class dim for the output.
    k_pad = _round_up(max(n_features, 128), 128)
    c_pad = _round_up(max(n_classes, 128), 128)

    vmem_cap = _vmem_capacity_bytes()
    vmem_limit = int(min(vmem_cap - 8 * _MIB, 100 * _MIB))  # ~56 MiB v7x, 100 MiB v5e/v6e
    max_tile_b = 1024 if vmem_cap >= 128 * _MIB else 512
    tile_b, padded_batch = _choose_batch_tiling(
        batch, k_pad, h1_dim, h2_dim, c_pad, max_tile_b,
        vmem_budget=int(vmem_limit * 0.75))

    # Cast x straight to bf16 and pad once: no intermediate f32 HBM materialization.
    xb = jnp.pad(x.astype(jnp.bfloat16),
                 ((0, padded_batch - batch), (0, k_pad - n_features)))
    w1b = jnp.pad(w1, ((0, k_pad - n_features), (0, 0))).astype(jnp.bfloat16)
    w2b = w2.astype(jnp.bfloat16)
    w3b = jnp.pad(w3, ((0, 0), (0, c_pad - n_classes))).astype(jnp.bfloat16)
    b1f = b1.astype(jnp.float32)
    b2f = b2.astype(jnp.float32)
    # Large negative *finite* pad bias (kept f32, pad w3 columns are exactly zero).
    b3f = jnp.pad(b3.astype(jnp.float32), ((0, 0), (0, c_pad - n_classes)),
                  constant_values=-1e30)

    grid = (padded_batch // tile_b,)
    flops = 2 * padded_batch * (k_pad * h1_dim + h1_dim * h2_dim + h2_dim * c_pad)
    bytes_accessed = (
        xb.size * 2
        + (w1b.size + w2b.size + w3b.size) * 2
        + (b1f.size + b2f.size + b3f.size) * 4
        + padded_batch * c_pad * 4
    )
    transcendentals = padded_batch * (c_pad + 1)

    def run(single_buffer_weights):
        if single_buffer_weights:
            # Resident operands (constant index_map) don't need double buffers.
            def resident(shape):
                return pl.BlockSpec(shape, lambda i: (0, 0),
                                    pipeline_mode=pl.Buffered(1))
        else:
            def resident(shape):
                return pl.BlockSpec(shape, lambda i: (0, 0))

        out = pl.pallas_call(
            dense_network_kernel,
            out_shape=jax.ShapeDtypeStruct((padded_batch, c_pad), jnp.float32),
            grid=grid,
            in_specs=[
                pl.BlockSpec((tile_b, k_pad), lambda i: (i, 0)),  # x: tiled over batch
                resident((k_pad, h1_dim)),                        # w1 (feature-padded)
                resident((1, h1_dim)),                            # b1
                resident((h1_dim, h2_dim)),                       # w2
                resident((1, h2_dim)),                            # b2
                resident((h2_dim, c_pad)),                        # w3 (class-padded)
                resident((1, c_pad)),                             # b3 (class-padded)
            ],
            out_specs=pl.BlockSpec((tile_b, c_pad), lambda i: (i, 0)),
            compiler_params=pltpu.CompilerParams(
                dimension_semantics=("parallel",),
                vmem_limit_bytes=vmem_limit,
            ),
            cost_estimate=pl.CostEstimate(
                flops=flops,
                transcendentals=transcendentals,
                bytes_accessed=bytes_accessed,
            ),
        )(xb, w1b, b1f, w2b, b2f, w3b, b3f)
        return jax.block_until_ready(out)

    try:
        out_padded = run(single_buffer_weights=True)
    except Exception:
        # pipeline_mode=pl.Buffered(1) unsupported by this JAX/Mosaic build;
        # fall back to default double buffering (VMEM budget already leaves slack).
        out_padded = run(single_buffer_weights=False)

    return out_padded[:batch, :n_classes]


def init_params(key, n_features, n_classes):
    """Deterministic init mimicking nn.Linear's U(-1/sqrt(fan_in), 1/sqrt(fan_in))."""
    def linear(k, fan_in, fan_out):
        kw, kb = jax.random.split(k)
        bound = 1.0 / jnp.sqrt(jnp.float32(fan_in))
        w = jax.random.uniform(kw, (fan_in, fan_out), jnp.float32, -bound, bound)
        b = jax.random.uniform(kb, (1, fan_out), jnp.float32, -bound, bound)
        return w, b

    k1, k2, k3 = jax.random.split(key, 3)
    w1, b1 = linear(k1, n_features, 512)
    w2, b2 = linear(k2, 512, 256)
    w3, b3 = linear(k3, 256, n_classes)
    return (w1, b1, w2, b2, w3, b3)


def dense_network_reference(x, params):
    """Pure-JAX f32 reference (eval-mode forward)."""
    w1, b1, w2, b2, w3, b3 = params
    h1 = jnp.maximum(jnp.dot(x.astype(jnp.float32), w1) + b1, 0.0)
    h2 = jnp.maximum(jnp.dot(h1, w2) + b2, 0.0)
    z = jnp.dot(h2, w3) + b3
    return jax.nn.log_softmax(z, axis=1)


if __name__ == "__main__":
    key = jax.random.PRNGKey(0)
    k_x, k_p = jax.random.split(key)

    batch = 2
    n_features = 32
    n_classes = 10

    x = jax.random.normal(k_x, (batch, n_features), jnp.float32)
    params = init_params(k_p, n_features, n_classes)

    out = dense_network_forward(x, params)
    out = jax.block_until_ready(out)

    assert out.shape == (batch, n_classes)

    # log_softmax rows must exponentiate-and-sum to ~1.
    row_sums = jnp.sum(jnp.exp(out), axis=1)
    assert jnp.allclose(row_sums, 1.0, atol=1e-3), row_sums

    # Match the f32 reference within bf16-matmul tolerance.
    ref = dense_network_reference(x, params)
    assert jnp.allclose(out, ref, atol=5e-2, rtol=5e-2), jnp.max(jnp.abs(out - ref))

    print("KERNEL_OK")
</pallas_src>

<mosaic_0001>
module attributes {stable_mosaic.version = 11 : i64} {
  func.func @dense_network_kernel(%arg0: i32, %arg1: memref<8x128xbf16, #tpu.memory_space<vmem>>, %arg2: memref<128x512xbf16, #tpu.memory_space<vmem>>, %arg3: memref<1x512xf32, #tpu.memory_space<vmem>>, %arg4: memref<512x256xbf16, #tpu.memory_space<vmem>>, %arg5: memref<1x256xf32, #tpu.memory_space<vmem>>, %arg6: memref<256x128xbf16, #tpu.memory_space<vmem>>, %arg7: memref<1x128xf32, #tpu.memory_space<vmem>>, %arg8: memref<8x128xf32, #tpu.memory_space<vmem>>) attributes {dimension_semantics = [#tpu.dimension_semantics<parallel>], iteration_bounds = array<i64: 1>, scalar_prefetch = 0 : i64, scratch_operands = 0 : i64, tpu.core_type = #tpu.core_type<tc>, window_params = [{transform_indices = @transform_0, window_bounds = array<i64: 8, 128>}, {pipeline_mode = #tpu.pipeline_mode<synchronous>, transform_indices = @transform_1, window_bounds = array<i64: 128, 512>}, {pipeline_mode = #tpu.pipeline_mode<synchronous>, transform_indices = @transform_2, window_bounds = array<i64: 1, 512>}, {pipeline_mode = #tpu.pipeline_mode<synchronous>, transform_indices = @transform_3, window_bounds = array<i64: 512, 256>}, {pipeline_mode = #tpu.pipeline_mode<synchronous>, transform_indices = @transform_4, window_bounds = array<i64: 1, 256>}, {pipeline_mode = #tpu.pipeline_mode<synchronous>, transform_indices = @transform_5, window_bounds = array<i64: 256, 128>}, {pipeline_mode = #tpu.pipeline_mode<synchronous>, transform_indices = @transform_6, window_bounds = array<i64: 1, 128>}, {transform_indices = @transform_7, window_bounds = array<i64: 8, 128>}]} {
    %c0 = arith.constant 0 : index
    %c0_0 = arith.constant 0 : index
    %0 = vector.load %arg1[%c0, %c0_0] : memref<8x128xbf16, #tpu.memory_space<vmem>>, vector<8x128xbf16>
    %c0_1 = arith.constant 0 : index
    %c0_2 = arith.constant 0 : index
    %1 = vector.load %arg2[%c0_1, %c0_2] : memref<128x512xbf16, #tpu.memory_space<vmem>>, vector<128x512xbf16>
    %cst = arith.constant dense<0.000000e+00> : vector<8x512xf32>
    %2 = tpu.matmul %0, %1, %cst {dimension_numbers = #tpu.dot_dimension_numbers<[1], [0], [0], [1], [0, 0, 1, 1], [], []>} : vector<8x128xbf16>, vector<128x512xbf16>, vector<8x512xf32> -> vector<8x512xf32>
    %c0_3 = arith.constant 0 : index
    %c0_4 = arith.constant 0 : index
    %3 = vector.load %arg3[%c0_3, %c0_4] : memref<1x512xf32, #tpu.memory_space<vmem>>, vector<1x512xf32>
    %4 = vector.broadcast %3 : vector<1x512xf32> to vector<8x512xf32>
    %5 = arith.addf %2, %4 : vector<8x512xf32>
    %cst_5 = arith.constant 0.000000e+00 : f32
    %6 = vector.broadcast %cst_5 : f32 to vector<8x512xf32>
    %7 = arith.maximumf %5, %6 : vector<8x512xf32>
    %8 = arith.truncf %7 : vector<8x512xf32> to vector<8x512xbf16>
    %c0_6 = arith.constant 0 : index
    %c0_7 = arith.constant 0 : index
    %9 = vector.load %arg4[%c0_6, %c0_7] : memref<512x256xbf16, #tpu.memory_space<vmem>>, vector<512x256xbf16>
    %cst_8 = arith.constant dense<0.000000e+00> : vector<8x256xf32>
    %10 = tpu.matmul %8, %9, %cst_8 {dimension_numbers = #tpu.dot_dimension_numbers<[1], [0], [0], [1], [0, 0, 1, 1], [], []>} : vector<8x512xbf16>, vector<512x256xbf16>, vector<8x256xf32> -> vector<8x256xf32>
    %c0_9 = arith.constant 0 : index
    %c0_10 = arith.constant 0 : index
    %11 = vector.load %arg5[%c0_9, %c0_10] : memref<1x256xf32, #tpu.memory_space<vmem>>, vector<1x256xf32>
    %12 = vector.broadcast %11 : vector<1x256xf32> to vector<8x256xf32>
    %13 = arith.addf %10, %12 : vector<8x256xf32>
    %cst_11 = arith.constant 0.000000e+00 : f32
    %14 = vector.broadcast %cst_11 : f32 to vector<8x256xf32>
    %15 = arith.maximumf %13, %14 : vector<8x256xf32>
    %16 = arith.truncf %15 : vector<8x256xf32> to vector<8x256xbf16>
    %c0_12 = arith.constant 0 : index
    %c0_13 = arith.constant 0 : index
    %17 = vector.load %arg6[%c0_12, %c0_13] : memref<256x128xbf16, #tpu.memory_space<vmem>>, vector<256x128xbf16>
    %cst_14 = arith.constant dense<0.000000e+00> : vector<8x128xf32>
    %18 = tpu.matmul %16, %17, %cst_14 {dimension_numbers = #tpu.dot_dimension_numbers<[1], [0], [0], [1], [0, 0, 1, 1], [], []>} : vector<8x256xbf16>, vector<256x128xbf16>, vector<8x128xf32> -> vector<8x128xf32>
    %c0_15 = arith.constant 0 : index
    %c0_16 = arith.constant 0 : index
    %19 = vector.load %arg7[%c0_15, %c0_16] : memref<1x128xf32, #tpu.memory_space<vmem>>, vector<1x128xf32>
    %20 = vector.broadcast %19 : vector<1x128xf32> to vector<8x128xf32>
    %21 = arith.addf %18, %20 : vector<8x128xf32>
    %cst_17 = arith.constant dense<0xFF800000> : vector<8xf32>
    %22 = vector.multi_reduction <maximumf>, %21, %cst_17 [1] : vector<8x128xf32> to vector<8xf32>
    %23 = vector.shape_cast %22 : vector<8xf32> to vector<8x1xf32>
    %24 = vector.broadcast %23 : vector<8x1xf32> to vector<8x128xf32>
    %25 = arith.subf %21, %24 : vector<8x128xf32>
    %26 = math.exp %25 : vector<8x128xf32>
    %cst_18 = arith.constant dense<0.000000e+00> : vector<8xf32>
    %27 = vector.multi_reduction <add>, %26, %cst_18 [1] : vector<8x128xf32> to vector<8xf32>
    %28 = vector.shape_cast %27 : vector<8xf32> to vector<8x1xf32>
    %29 = math.log %28 : vector<8x1xf32>
    %30 = vector.broadcast %29 : vector<8x1xf32> to vector<8x128xf32>
    %31 = arith.subf %25, %30 : vector<8x128xf32>
    %c0_19 = arith.constant 0 : index
    %c0_20 = arith.constant 0 : index
    %32 = vector.load %arg8[%c0_19, %c0_20] : memref<8x128xf32, #tpu.memory_space<vmem>>, vector<8x128xf32>
    tpu.vector_store %arg8[%c0_19, %c0_20], %31 {strides = array<i32>} : memref<8x128xf32, #tpu.memory_space<vmem>>, vector<8x128xf32>,
    return
  }
  func.func @transform_0(%arg0: i32) -> (i32, i32) {
    %c0_i32 = arith.constant 0 : i32
    %c0_i32_0 = arith.constant 0 : i32
    return %arg0, %c0_i32 : i32, i32
  }
  func.func @transform_1(%arg0: i32) -> (i32, i32) {
    %c0_i32 = arith.constant 0 : i32
    %c0_i32_0 = arith.constant 0 : i32
    %c0_i32_1 = arith.constant 0 : i32
    return %c0_i32, %c0_i32_0 : i32, i32
  }
  func.func @transform_2(%arg0: i32) -> (i32, i32) {
    %c0_i32 = arith.constant 0 : i32
    %c0_i32_0 = arith.constant 0 : i32
    %c0_i32_1 = arith.constant 0 : i32
    return %c0_i32, %c0_i32_0 : i32, i32
  }
  func.func @transform_3(%arg0: i32) -> (i32, i32) {
    %c0_i32 = arith.constant 0 : i32
    %c0_i32_0 = arith.constant 0 : i32
    %c0_i32_1 = arith.constant 0 : i32
    return %c0_i32, %c0_i32_0 : i32, i32
  }
  func.func @transform_4(%arg0: i32) -> (i32, i32) {
    %c0_i32 = arith.constant 0 : i32
    %c0_i32_0 = arith.constant 0 : i32
    %c0_i32_1 = arith.constant 0 : i32
    return %c0_i32, %c0_i32_0 : i32, i32
  }
  func.func @transform_5(%arg0: i32) -> (i32, i32) {
    %c0_i32 = arith.constant 0 : i32
    %c0_i32_0 = arith.constant 0 : i32
    %c0_i32_1 = arith.constant 0 : i32
    return %c0_i32, %c0_i32_0 : i32, i32
  }
  func.func @transform_6(%arg0: i32) -> (i32, i32) {
    %c0_i32 = arith.constant 0 : i32
    %c0_i32_0 = arith.constant 0 : i32
    %c0_i32_1 = arith.constant 0 : i32
    return %c0_i32, %c0_i32_0 : i32, i32
  }
  func.func @transform_7(%arg0: i32) -> (i32, i32) {
    %c0_i32 = arith.constant 0 : i32
    %c0_i32_0 = arith.constant 0 : i32
    return %arg0, %c0_i32 : i32, i32
  }
}

module attributes {stable_mosaic.version = 11 : i64} {
  func.func @dense_network_kernel(%arg0: i32, %arg1: memref<8x128xbf16, #tpu.memory_space<vmem>>, %arg2: memref<128x512xbf16, #tpu.memory_space<vmem>>, %arg3: memref<1x512xf32, #tpu.memory_space<vmem>>, %arg4: memref<512x256xbf16, #tpu.memory_space<vmem>>, %arg5: memref<1x256xf32, #tpu.memory_space<vmem>>, %arg6: memref<256x128xbf16, #tpu.memory_space<vmem>>, %arg7: memref<1x128xf32, #tpu.memory_space<vmem>>, %arg8: memref<8x128xf32, #tpu.memory_space<vmem>>) attributes {dimension_semantics = [#tpu.dimension_semantics<parallel>], iteration_bounds = array<i64: 1>, scalar_prefetch = 0 : i64, scratch_operands = 0 : i64, tpu.core_type = #tpu.core_type<tc>, window_params = [{transform_indices = @transform_0, window_bounds = array<i64: 8, 128>}, {pipeline_mode = #tpu.pipeline_mode<synchronous>, transform_indices = @transform_1, window_bounds = array<i64: 128, 512>}, {pipeline_mode = #tpu.pipeline_mode<synchronous>, transform_indices = @transform_2, window_bounds = array<i64: 1, 512>}, {pipeline_mode = #tpu.pipeline_mode<synchronous>, transform_indices = @transform_3, window_bounds = array<i64: 512, 256>}, {pipeline_mode = #tpu.pipeline_mode<synchronous>, transform_indices = @transform_4, window_bounds = array<i64: 1, 256>}, {pipeline_mode = #tpu.pipeline_mode<synchronous>, transform_indices = @transform_5, window_bounds = array<i64: 256, 128>}, {pipeline_mode = #tpu.pipeline_mode<synchronous>, transform_indices = @transform_6, window_bounds = array<i64: 1, 128>}, {transform_indices = @transform_7, window_bounds = array<i64: 8, 128>}]} {
    %c0 = arith.constant 0 : index
    %c0_0 = arith.constant 0 : index
    %0 = vector.load %arg1[%c0, %c0_0] : memref<8x128xbf16, #tpu.memory_space<vmem>>, vector<8x128xbf16>
    %c0_1 = arith.constant 0 : index
    %c0_2 = arith.constant 0 : index
    %1 = vector.load %arg2[%c0_1, %c0_2] : memref<128x512xbf16, #tpu.memory_space<vmem>>, vector<128x512xbf16>
    %cst = arith.constant dense<0.000000e+00> : vector<8x512xf32>
    %2 = tpu.matmul %0, %1, %cst {dimension_numbers = #tpu.dot_dimension_numbers<[1], [0], [0], [1], [0, 0, 1, 1], [], []>} : vector<8x128xbf16>, vector<128x512xbf16>, vector<8x512xf32> -> vector<8x512xf32>
    %c0_3 = arith.constant 0 : index
    %c0_4 = arith.constant 0 : index
    %3 = vector.load %arg3[%c0_3, %c0_4] : memref<1x512xf32, #tpu.memory_space<vmem>>, vector<1x512xf32>
    %4 = vector.broadcast %3 : vector<1x512xf32> to vector<8x512xf32>
    %5 = arith.addf %2, %4 : vector<8x512xf32>
    %cst_5 = arith.constant 0.000000e+00 : f32
    %6 = vector.broadcast %cst_5 : f32 to vector<8x512xf32>
    %7 = arith.maximumf %5, %6 : vector<8x512xf32>
    %8 = arith.truncf %7 : vector<8x512xf32> to vector<8x512xbf16>
    %c0_6 = arith.constant 0 : index
    %c0_7 = arith.constant 0 : index
    %9 = vector.load %arg4[%c0_6, %c0_7] : memref<512x256xbf16, #tpu.memory_space<vmem>>, vector<512x256xbf16>
    %cst_8 = arith.constant dense<0.000000e+00> : vector<8x256xf32>
    %10 = tpu.matmul %8, %9, %cst_8 {dimension_numbers = #tpu.dot_dimension_numbers<[1], [0], [0], [1], [0, 0, 1, 1], [], []>} : vector<8x512xbf16>, vector<512x256xbf16>, vector<8x256xf32> -> vector<8x256xf32>
    %c0_9 = arith.constant 0 : index
    %c0_10 = arith.constant 0 : index
    %11 = vector.load %arg5[%c0_9, %c0_10] : memref<1x256xf32, #tpu.memory_space<vmem>>, vector<1x256xf32>
    %12 = vector.broadcast %11 : vector<1x256xf32> to vector<8x256xf32>
    %13 = arith.addf %10, %12 : vector<8x256xf32>
    %cst_11 = arith.constant 0.000000e+00 : f32
    %14 = vector.broadcast %cst_11 : f32 to vector<8x256xf32>
    %15 = arith.maximumf %13, %14 : vector<8x256xf32>
    %16 = arith.truncf %15 : vector<8x256xf32> to vector<8x256xbf16>
    %c0_12 = arith.constant 0 : index
    %c0_13 = arith.constant 0 : index
    %17 = vector.load %arg6[%c0_12, %c0_13] : memref<256x128xbf16, #tpu.memory_space<vmem>>, vector<256x128xbf16>
    %cst_14 = arith.constant dense<0.000000e+00> : vector<8x128xf32>
    %18 = tpu.matmul %16, %17, %cst_14 {dimension_numbers = #tpu.dot_dimension_numbers<[1], [0], [0], [1], [0, 0, 1, 1], [], []>} : vector<8x256xbf16>, vector<256x128xbf16>, vector<8x128xf32> -> vector<8x128xf32>
    %c0_15 = arith.constant 0 : index
    %c0_16 = arith.constant 0 : index
    %19 = vector.load %arg7[%c0_15, %c0_16] : memref<1x128xf32, #tpu.memory_space<vmem>>, vector<1x128xf32>
    %20 = vector.broadcast %19 : vector<1x128xf32> to vector<8x128xf32>
    %21 = arith.addf %18, %20 : vector<8x128xf32>
    %cst_17 = arith.constant dense<0xFF800000> : vector<8xf32>
    %22 = vector.multi_reduction <maximumf>, %21, %cst_17 [1] : vector<8x128xf32> to vector<8xf32>
    %23 = vector.shape_cast %22 : vector<8xf32> to vector<8x1xf32>
    %24 = vector.broadcast %23 : vector<8x1xf32> to vector<8x128xf32>
    %25 = arith.subf %21, %24 : vector<8x128xf32>
    %26 = math.exp %25 : vector<8x128xf32>
    %cst_18 = arith.constant dense<0.000000e+00> : vector<8xf32>
    %27 = vector.multi_reduction <add>, %26, %cst_18 [1] : vector<8x128xf32> to vector<8xf32>
    %28 = vector.shape_cast %27 : vector<8xf32> to vector<8x1xf32>
    %29 = math.log %28 : vector<8x1xf32>
    %30 = vector.broadcast %29 : vector<8x1xf32> to vector<8x128xf32>
    %31 = arith.subf %25, %30 : vector<8x128xf32>
    %c0_19 = arith.constant 0 : index
    %c0_20 = arith.constant 0 : index
    %32 = vector.load %arg8[%c0_19, %c0_20] : memref<8x128xf32, #tpu.memory_space<vmem>>, vector<8x128xf32>
    tpu.vector_store %arg8[%c0_19, %c0_20], %31 {strides = array<i32>} : memref<8x128xf32, #tpu.memory_space<vmem>>, vector<8x128xf32>,
    return
  }
  func.func @transform_0(%arg0: i32) -> (i32, i32) {
    %c0_i32 = arith.constant 0 : i32
    %c0_i32_0 = arith.constant 0 : i32
    return %arg0, %c0_i32 : i32, i32
  }
  func.func @transform_1(%arg0: i32) -> (i32, i32) {
    %c0_i32 = arith.constant 0 : i32
    %c0_i32_0 = arith.constant 0 : i32
    %c0_i32_1 = arith.constant 0 : i32
    return %c0_i32, %c0_i32_0 : i32, i32
  }
  func.func @transform_2(%arg0: i32) -> (i32, i32) {
    %c0_i32 = arith.constant 0 : i32
    %c0_i32_0 = arith.constant 0 : i32
    %c0_i32_1 = arith.constant 0 : i32
    return %c0_i32, %c0_i32_0 : i32, i32
  }
  func.func @transform_3(%arg0: i32) -> (i32, i32) {
    %c0_i32 = arith.constant 0 : i32
    %c0_i32_0 = arith.constant 0 : i32
    %c0_i32_1 = arith.constant 0 : i32
    return %c0_i32, %c0_i32_0 : i32, i32
  }
  func.func @transform_4(%arg0: i32) -> (i32, i32) {
    %c0_i32 = arith.constant 0 : i32
    %c0_i32_0 = arith.constant 0 : i32
    %c0_i32_1 = arith.constant 0 : i32
    return %c0_i32, %c0_i32_0 : i32, i32
  }
  func.func @transform_5(%arg0: i32) -> (i32, i32) {
    %c0_i32 = arith.constant 0 : i32
    %c0_i32_0 = arith.constant 0 : i32
    %c0_i32_1 = arith.constant 0 : i32
    return %c0_i32, %c0_i32_0 : i32, i32
  }
  func.func @transform_6(%arg0: i32) -> (i32, i32) {
    %c0_i32 = arith.constant 0 : i32
    %c0_i32_0 = arith.constant 0 : i32
    %c0_i32_1 = arith.constant 0 : i32
    return %c0_i32, %c0_i32_0 : i32, i32
  }
  func.func @transform_7(%arg0: i32) -> (i32, i32) {
    %c0_i32 = arith.constant 0 : i32
    %c0_i32_0 = arith.constant 0 : i32
    return %arg0, %c0_i32 : i32, i32
  }
}

</mosaic_0001>

<bundles_post_ra>
// kernel: tpu_custom_call.1
= control target key start
LH: loop header
LB: loop body
LE: loop exit
PB: predicated region body
PF: predicated region fallthrough
CT: control target
= control target key end

     0   :  { %12 = vsyncpa [#allocation3], 0  ;;  %s1651_s0 = inlined_call_operand.hbm [shape: bf16[8,128], index: 0, kind: input, shape index: {}]   ;;  %s1652_s1 = inlined_call_operand.hbm [shape: bf16[128,512], index: 1, kind: input, shape index: {}]   ;;  %s1653_s2 = inlined_call_operand.vmem [shape: f32[1,512], index: 2, kind: input, shape index: {}]   ;;  %s1654_s3 = inlined_call_operand.hbm [shape: bf16[512,256], index: 3, kind: input, shape index: {}]   ;;  %s1655_s4 = inlined_call_operand.vmem [shape: f32[1,256], index: 4, kind: input, shape index: {}]   ;;  %s1656_s5 = inlined_call_operand.hbm [shape: bf16[256,128], index: 5, kind: input, shape index: {}]   ;;  %s1657_s6 = inlined_call_operand.vmem [shape: f32[1,128], index: 6, kind: input, shape index: {}]   ;;  %s1658_s7 = inlined_call_operand.hbm [shape: f32[8,128], index: 7, kind: output, shape index: {}]  }
   0x1   :  { %13 = vsyncpa [#allocation6], 0 }
   0x2   :  { %14 = vsyncpa [#allocation9], 0 }
   0x3   :  { %15 = vsyncpa [#allocation4], 0  ;;  %s1506_s24 = smov [#allocation5]   ;;  %s1388_s28 = scalar_lea.hbm %s1652_s1, 4096 }
   0x4   :  { %s31_s25 = sshll.u32 %s1506_s24, 4  ;;  %p1389_p0 = scmp.ne.s32.totalorder %s1652_s1, %s1388_s28  ;;  %s32_s25 = int_to_ptr.vmem [resolvable:$true] %s31_s25 }
   0x5   :  { %p1392_p1 = scmp.lt.u32.totalorder %s1388_s28, %s1652_s1 }
   0x7   :  { %p1394_p2 = pnand %p1392_p1, %p1389_p0 }
   0x9   :  { %1397 = shalt.err (!%p1394_p2)
}
   0xa   :  { %s1398_s10 = scalar_lea.vmem %s32_s25, 4096  ;;  %p1403_p4 = scmp.lt.s32.totalorder %s32_s25, %s32_s25 }
   0xb   :  { %p1399_p3 = scmp.ne.s32.totalorder %s32_s25, %s1398_s10  ;;  %p1404_p5 = scmp.lt.s32.totalorder %s1398_s10, %s1398_s10 }
   0xd   :  { %p1405_p6 = por %p1404_p5, %p1403_p4 }
   0xf   :  { %p1406_p7 = pnand %p1405_p6, %p1399_p3 }
  0x11   :  { %1409 = shalt.err (!%p1406_p7)
}
  0x12   :  { %s1507_s11 = smov 256   ;;  %s1508_s12 = smov 16  }
  0x13   :  { %37 = dma.hbm_to_vmem [thread:$0]  %s1652_s1, 4096, %s32_s25, [#allocation6], %s1507_s11, %s1507_s11, %s1508_s12  }
  0x14   :  { %s1509_s15 = smov [#allocation2]   ;;  %s1510_s17 = smov [#allocation7]  }
  0x15   :  { %s22_s16 = sshll.u32 %s1509_s15, 4  ;;  %s45_s18 = sshll.u32 %s1510_s17, 4  ;;  %s23_s16 = int_to_ptr.vmem [resolvable:$true] %s22_s16  ;;  %s46_s18 = int_to_ptr.vmem [resolvable:$true] %s45_s18 }
  0x16   :  { %s1410_s21 = scalar_lea.hbm %s1651_s0, 64 }
  0x17   :  { %p1411_p8 = scmp.ne.s32.totalorder %s1651_s0, %s1410_s21  ;;  %p1414_p9 = scmp.lt.u32.totalorder %s1410_s21, %s1651_s0 }
  0x19   :  { %p1416_p10 = pnand %p1414_p9, %p1411_p8 }
  0x1b   :  { %1419 = shalt.err (!%p1416_p10)
}
  0x1c   :  { %s1420_s1 = scalar_lea.vmem %s23_s16, 64  ;;  %p1425_p12 = scmp.lt.s32.totalorder %s23_s16, %s23_s16 }
  0x1d   :  { %p1421_p11 = scmp.ne.s32.totalorder %s23_s16, %s1420_s1  ;;  %p1426_p13 = scmp.lt.s32.totalorder %s1420_s1, %s1420_s1 }
  0x1f   :  { %p1427_p0 = por %p1426_p13, %p1425_p12 }
  0x21   :  { %p1428_p1 = pnand %p1427_p0, %p1421_p11 }
  0x23   :  { %1431 = shalt.err (!%p1428_p1)
}
  0x24   :  { %25 = dma.hbm_to_vmem [thread:$0]  %s1651_s0, 64, %s23_s16, [#allocation3]  }
  0x25   :  { %s1432_s30 = scalar_lea.hbm %s1654_s3, 8192 }
  0x26   :  { %p1433_p2 = scmp.ne.s32.totalorder %s1654_s3, %s1432_s30  ;;  %p1436_p3 = scmp.lt.u32.totalorder %s1432_s30, %s1654_s3 }
  0x28   :  { %p1438_p4 = pnand %p1436_p3, %p1433_p2 }
  0x2a   :  { %1441 = shalt.err (!%p1438_p4)
}
  0x2b   :  { %s1442_s12 = scalar_lea.vmem %s46_s18, 8192  ;;  %p1447_p6 = scmp.lt.s32.totalorder %s46_s18, %s46_s18 }
  0x2c   :  { %p1443_p5 = scmp.ne.s32.totalorder %s46_s18, %s1442_s12  ;;  %p1448_p7 = scmp.lt.s32.totalorder %s1442_s12, %s1442_s12 }
  0x2e   :  { %p1449_p8 = por %p1448_p7, %p1447_p6 }
  0x30   :  { %p1450_p9 = pnand %p1449_p8, %p1443_p5 }
  0x32   :  { %1453 = shalt.err (!%p1450_p9)
}
  0x33   :  { %s1511_s0 = smov 128   ;;  %s1512_s13 = smov 8  }
  0x34   :  { %51 = dma.hbm_to_vmem [thread:$0]  %s1654_s3, 8192, %s46_s18, [#allocation6], %s1511_s0, %s1511_s0, %s1512_s13  }
  0x35   :  { %s1513_s16 = smov [#allocation8]   ;;  %s1454_s21 = scalar_lea.hbm %s1656_s5, 2048 }
  0x36   :  { %s59_s17 = sshll.u32 %s1513_s16, 4  ;;  %p1455_p10 = scmp.ne.s32.totalorder %s1656_s5, %s1454_s21  ;;  %s60_s17 = int_to_ptr.vmem [resolvable:$true] %s59_s17 }
  0x37   :  { %p1458_p11 = scmp.lt.u32.totalorder %s1454_s21, %s1656_s5 }
  0x39   :  { %p1460_p12 = pnand %p1458_p11, %p1455_p10 }
  0x3b   :  { %1463 = shalt.err (!%p1460_p12)
}
  0x3c   :  { %s1464_s1 = scalar_lea.vmem %s60_s17, 2048  ;;  %p1469_p0 = scmp.lt.s32.totalorder %s60_s17, %s60_s17 }
  0x3d   :  { %p1465_p13 = scmp.ne.s32.totalorder %s60_s17, %s1464_s1  ;;  %p1470_p1 = scmp.lt.s32.totalorder %s1464_s1, %s1464_s1 }
  0x3f   :  { %p1471_p2 = por %p1470_p1, %p1469_p0 }
  0x41   :  { %p1472_p3 = pnand %p1471_p2, %p1465_p13 }
  0x43   :  { %1475 = shalt.err (!%p1472_p3)
}
  0x44   :  { %s1514_s3 = smov 64   ;;  %s1515_s18 = smov 4  }
  0x45   :  { %65 = dma.hbm_to_vmem [thread:$0]  %s1656_s5, 2048, %s60_s17, [#allocation9], %s1514_s3, %s1514_s3, %s1515_s18  }
  0x46   :  { %1498 = dma.done.wait [#allocation3], 64  }
  0x47   :  { %1499 = vsyncadd [#allocation3], 4294967232 }
  0x48   :  { %1500 = dma.done.wait [#allocation6], 12288  }
  0x49   :  { %1501 = vsyncadd [#allocation6], 4294955008 }
  0x4a   :  { %1502 = dma.done.wait [#allocation9], 2048  }
  0x4b   :  { %1503 = vsyncadd [#allocation9], 4294965248  ;;  %v1516_v0 = vmov 0   ;;  %v1224_v1 = vld [vmem:[#allocation5 + $0x4] ss:$16 sps:$4 sm:$0xff]   ;;  %s1517_s8 = smov [#allocation10]  }
  0x4c   :  { %328 = vmatprep.mubr.bf16.mxu1 %v1516_v0  ;;  %v1226_v2 = vld [vmem:[#allocation5] ss:$16 sps:$4 sm:$0xff]   ;;  %296 = vmatprep.subr.bf16.mxu1 %v1224_v1  ;;  %v1227_v3 = vld [vmem:[#allocation5 + $0x24] ss:$16 sps:$4 sm:$0xff]   ;;  %v1250_v22 = vld [vmem:[#allocation5 + $0xc] ss:$16 sps:$4 sm:$0xff]  }
  0x4d   :  { %297 = vmatpush1.bf16.msra.mxu1 %v1226_v2  ;;  %v1229_v4 = vld [vmem:[#allocation5 + $0x20] ss:$16 sps:$4 sm:$0xff]   ;;  %v1230_v5 = vld [vmem:[#allocation5 + $0x44] ss:$16 sps:$4 sm:$0xff]   ;;  %v1606_v24 = vld [vmem:[#allocation2] sm:$0xf] }
  0x4e   :  { %298 = vmatprep.subr.bf16.mxu1 %v1227_v3  ;;  %v1232_v6 = vld [vmem:[#allocation5 + $0x40] ss:$16 sps:$4 sm:$0xff]   ;;  %v1233_v7 = vld [vmem:[#allocation5 + $0x64] ss:$16 sps:$4 sm:$0xff]   ;;  %v1248_v26 = vld [vmem:[#allocation5 + $0x8] ss:$16 sps:$4 sm:$0xff]  }
  0x4f   :  { %v1235_v8 = vld [vmem:[#allocation5 + $0x60] ss:$16 sps:$4 sm:$0xff]   ;;  %v1236_v9 = vld [vmem:[#allocation5 + $0x84] ss:$16 sps:$4 sm:$0xff]   ;;  %v1253_v27 = vld [vmem:[#allocation5 + $0x2c] ss:$16 sps:$4 sm:$0xff]  }
  0x50   :  { %v1238_v10 = vld [vmem:[#allocation5 + $0x80] ss:$16 sps:$4 sm:$0xff]   ;;  %v1239_v11 = vld [vmem:[#allocation5 + $0xa4] ss:$16 sps:$4 sm:$0xff]   ;;  %v1251_v30 = vld [vmem:[#allocation5 + $0x28] ss:$16 sps:$4 sm:$0xff]  }
  0x51   :  { %299 = vmatpush1.bf16.msra.mxu1 %v1229_v4  ;;  %v1241_v12 = vld [vmem:[#allocation5 + $0xa0] ss:$16 sps:$4 sm:$0xff]   ;;  %v1242_v13 = vld [vmem:[#allocation5 + $0xc4] ss:$16 sps:$4 sm:$0xff]   ;;  %v1256_v31 = vld [vmem:[#allocation5 + $0x4c] ss:$16 sps:$4 sm:$0xff]  }
  0x52   :  { %300 = vmatprep.subr.bf16.mxu1 %v1230_v5  ;;  %v1244_v14 = vld [vmem:[#allocation5 + $0xc0] ss:$16 sps:$4 sm:$0xff]   ;;  %v1272_v15 = vld [vmem:[#allocation7 + $0x4] ss:$8 sps:$4 sm:$0xff]   ;;  %v1275_v17 = vld [vmem:[#allocation7 + $0x14] ss:$8 sps:$4 sm:$0xff]  }
  0x53   :  { %v1274_v16 = vld [vmem:[#allocation7] ss:$8 sps:$4 sm:$0xff]   ;;  %v1245_v18 = vld [vmem:[#allocation5 + $0xe4] ss:$16 sps:$4 sm:$0xff]   ;;  %782 = vmatprep.subr.bf16.mxu0 %v1272_v15  ;;  %v1277_v19 = vld [vmem:[#allocation7 + $0x10] ss:$8 sps:$4 sm:$0xff]   ;;  %v116_v15 = vlaneseq }
  0x54   :  { %783 = vmatpush1.bf16.msra.mxu0 %v1274_v16  ;;  %v1278_v20 = vld [vmem:[#allocation7 + $0x24] ss:$8 sps:$4 sm:$0xff]   ;;  %v1247_v21 = vld [vmem:[#allocation5 + $0xe0] ss:$16 sps:$4 sm:$0xff]   ;;  %v1281_v25 = vld [vmem:[#allocation7 + $0x34] ss:$8 sps:$4 sm:$0xff]  }
  0x55   :  { %301 = vmatpush1.bf16.msra.mxu1 %v1232_v6  ;;  %784 = vmatprep.subr.bf16.mxu0 %v1275_v17  ;;  %v1280_v23 = vld [vmem:[#allocation7 + $0x20] ss:$8 sps:$4 sm:$0xff]   ;;  %v1283_v28 = vld [vmem:[#allocation7 + $0x30] ss:$8 sps:$4 sm:$0xff]   ;;  %v1284_v29 = vld [vmem:[#allocation7 + $0x44] ss:$8 sps:$4 sm:$0xff]  }
  0x56   :  { %302 = vmatprep.subr.bf16.mxu1 %v1233_v7  ;;  %v1286_v32 = vld [vmem:[#allocation7 + $0x40] ss:$8 sps:$4 sm:$0xff]   ;;  %v1287_v34 = vld [vmem:[#allocation7 + $0x54] ss:$8 sps:$4 sm:$0xff]   ;;  %v1289_v36 = vld [vmem:[#allocation7 + $0x50] ss:$8 sps:$4 sm:$0xff]  }
  0x57   :  { %v1254_v33 = vld [vmem:[#allocation5 + $0x48] ss:$16 sps:$4 sm:$0xff]   ;;  %v1259_v35 = vld [vmem:[#allocation5 + $0x6c] ss:$16 sps:$4 sm:$0xff]   ;;  %v1368_v3 = vld [vmem:[#allocation8 + $0x40] sm:$0xff]   ;;  %v1610_v16 = vshrl.u32 %v116_v15, 7 }
  0x58   :  { %785 = vmatpush1.bf16.msra.mxu0 %v1277_v19  ;;  %v1290_v37 = vld [vmem:[#allocation7 + $0x64] ss:$8 sps:$4 sm:$0xff]   ;;  %v1257_v38 = vld [vmem:[#allocation5 + $0x68] ss:$16 sps:$4 sm:$0xff]   ;;  %v1293_v41 = vld [vmem:[#allocation7 + $0x74] ss:$8 sps:$4 sm:$0xff]  }
  0x59   :  { %303 = vmatpush1.bf16.msra.mxu1 %v1235_v8  ;;  %786 = vmatprep.subr.bf16.mxu0 %v1278_v20  ;;  %v1262_v39 = vld [vmem:[#allocation5 + $0x8c] ss:$16 sps:$4 sm:$0xff]   ;;  %v1292_v40 = vld [vmem:[#allocation7 + $0x60] ss:$8 sps:$4 sm:$0xff]   ;;  %v1295_v44 = vld [vmem:[#allocation7 + $0x70] ss:$8 sps:$4 sm:$0xff]  }
  0x5a   :  { %304 = vmatprep.subr.bf16.mxu1 %v1236_v9  ;;  %v1260_v42 = vld [vmem:[#allocation5 + $0x88] ss:$16 sps:$4 sm:$0xff]   ;;  %v1265_v43 = vld [vmem:[#allocation5 + $0xac] ss:$16 sps:$4 sm:$0xff]   ;;  %v1369_v4 = vld [vmem:[#allocation8] sm:$0xff]   ;;  %v118_v17 = vsub.s32 0, %v1610_v16 }
  0x5b   :  { %v1296_v45 = vld [vmem:[#allocation7 + $0x84] ss:$8 sps:$4 sm:$0xff]   ;;  %v1263_v46 = vld [vmem:[#allocation5 + $0xa8] ss:$16 sps:$4 sm:$0xff]   ;;  %v1299_v49 = vld [vmem:[#allocation7 + $0x94] ss:$8 sps:$4 sm:$0xff]  }
  0x5c   :  { %787 = vmatpush1.bf16.msra.mxu0 %v1280_v23  ;;  %v1268_v47 = vld [vmem:[#allocation5 + $0xcc] ss:$16 sps:$4 sm:$0xff]   ;;  %v1298_v48 = vld [vmem:[#allocation7 + $0x80] ss:$8 sps:$4 sm:$0xff]   ;;  %v1301_v52 = vld [vmem:[#allocation7 + $0x90] ss:$8 sps:$4 sm:$0xff]  }
  0x5d   :  { %305 = vmatpush1.bf16.msra.mxu1 %v1238_v10  ;;  %788 = vmatprep.subr.bf16.mxu0 %v1281_v25  ;;  %v1266_v50 = vld [vmem:[#allocation5 + $0xc8] ss:$16 sps:$4 sm:$0xff]   ;;  %v1271_v51 = vld [vmem:[#allocation5 + $0xec] ss:$16 sps:$4 sm:$0xff]   ;;  %v1372_v7 = vld [vmem:[#allocation8 + $0x50] sm:$0xff]   ;;  %v122_v19 = vsub.s32 1, %v1610_v16 }
  0x5e   :  { %306 = vmatprep.subr.bf16.mxu1 %v1239_v11  ;;  %v1302_v53 = vld [vmem:[#allocation7 + $0xa4] ss:$8 sps:$4 sm:$0xff]   ;;  %v1269_v54 = vld [vmem:[#allocation5 + $0xe8] ss:$16 sps:$4 sm:$0xff]   ;;  %v1305_v56 = vld [vmem:[#allocation7 + $0xb4] ss:$8 sps:$4 sm:$0xff]  }
  0x5f   :  { %v1304_v55 = vld [vmem:[#allocation7 + $0xa0] ss:$8 sps:$4 sm:$0xff]   ;;  %v1307_v57 = vld [vmem:[#allocation7 + $0xb0] ss:$8 sps:$4 sm:$0xff]   ;;  %v1308_v58 = vld [vmem:[#allocation7 + $0xc4] ss:$8 sps:$4 sm:$0xff]  }
  0x60   :  { %789 = vmatpush1.bf16.msra.mxu0 %v1283_v28  ;;  %v1310_v59 = vld [vmem:[#allocation7 + $0xc0] ss:$8 sps:$4 sm:$0xff]   ;;  %v1311_v60 = vld [vmem:[#allocation7 + $0xd4] ss:$8 sps:$4 sm:$0xff]   ;;  %v1313_v61 = vld [vmem:[#allocation7 + $0xd0] ss:$8 sps:$4 sm:$0xff]  }
  0x61   :  { %307 = vmatpush1.bf16.msra.mxu1 %v1241_v12  ;;  %790 = vmatprep.subr.bf16.mxu0 %v1284_v29  ;;  %v1314_v62 = vld [vmem:[#allocation7 + $0xe4] ss:$8 sps:$4 sm:$0xff]   ;;  %v1316_v63 = vld [vmem:[#allocation7 + $0xe0] ss:$8 sps:$4 sm:$0xff]   ;;  %v1319_v1 = vld [vmem:[#allocation7 + $0xf0] ss:$8 sps:$4 sm:$0xff]  }
  0x62   :  { %308 = vmatprep.subr.bf16.mxu1 %v1242_v13  ;;  %v1322_v2 = vld [vmem:[#allocation7 + $0x104] ss:$8 sps:$4 sm:$0xff]   ;;  %v1373_v8 = vld [vmem:[#allocation8 + $0x10] sm:$0xff]   ;;  %v1374_v9 = vld [vmem:[#allocation8 + $0x58] sm:$0xff]   ;;  %s1060_s9 = sshll.u32 %s1517_s8, 4  ;;  %s1061_s9 = int_to_ptr.vmem [resolvable:$true] %s1060_s9 }
  0x63   :  { %v1370_v5 = vld [vmem:[#allocation8 + $0x48] sm:$0xff]   ;;  %v1375_v10 = vld [vmem:[#allocation8 + $0x18] sm:$0xff]   ;;  %v1376_v11 = vld [vmem:[#allocation8 + $0x60] sm:$0xff]   ;;  %p1481_p5 = scmp.lt.s32.totalorder %s1061_s9, %s1061_s9 }
  0x64   :  { %791 = vmatpush1.bf16.msra.mxu0 %v1286_v32  ;;  %v1371_v6 = vld [vmem:[#allocation8 + $0x8] sm:$0xff]   ;;  %v1377_v12 = vld [vmem:[#allocation8 + $0x20] sm:$0xff]   ;;  %v1382_v15 = vld [vmem:[#allocation8 + $0x78] sm:$0xff]  }
  0x65   :  { %309 = vmatpush1.bf16.msra.mxu1 %v1244_v14  ;;  %792 = vmatprep.subr.bf16.mxu0 %v1287_v34  ;;  %v1378_v13 = vld [vmem:[#allocation8 + $0x68] sm:$0xff]   ;;  %v1323_v34 = vld [vmem:[#allocation7 + $0x110] ss:$8 sps:$4 sm:$0xff]  }
  0x66   :  { %310 = vmatprep.subr.bf16.mxu1 %v1245_v18  ;;  %v1379_v14 = vld [vmem:[#allocation8 + $0x28] sm:$0xff]   ;;  %v1616_v18 = vld [vmem:[%s1653_s2] sm:$0xf] }
  0x67   :  { %v119_v20 = vrot.slane %v1616_v18, %v118_v17 }
  0x68   :  { %793 = vmatpush1.bf16.msra.mxu0 %v1289_v36  ;;  %v1326_v36 = vld [vmem:[#allocation7 + $0x120] ss:$8 sps:$4 sm:$0xff]  }
  0x69   :  { %311 = vmatpush1.bf16.msra.mxu1 %v1247_v21  ;;  %794 = vmatprep.subr.bf16.mxu0 %v1290_v37  ;;  %v123_v21 = vrot.slane %v1616_v18, %v122_v19  ;;  %v1331_v37 = vld [vmem:[#allocation7 + $0x134] ss:$8 sps:$4 sm:$0xff]  }
  0x6a   :  { %337 = vmatprep.subr.bf16.mxu1 %v1250_v22 }
  0x6c   :  { %329 = vmatmul.mubr.bf16.vlgmr.msra.gmra.mrb[0].mxu1 %v1606_v24  ;;  %795 = vmatpush1.bf16.msra.mxu0 %v1292_v40  ;;  %v1332_v40 = vld [vmem:[#allocation7 + $0x140] ss:$8 sps:$4 sm:$0xff]  }
  0x6d   :  { %338 = vmatpush1.bf16.msra.mxu1 %v1248_v26  ;;  %369 = vmatprep.mubr.bf16.mxu1 %v1516_v0  ;;  %v1317_v0 = vld [vmem:[#allocation7 + $0xf4] ss:$8 sps:$4 sm:$0xff]  }
  0x6e   :  { %339 = vmatprep.subr.bf16.mxu1 %v1253_v27  ;;  %796 = vmatprep.subr.bf16.mxu0 %v1293_v41  ;;  %v1337_v41 = vld [vmem:[#allocation7 + $0x154] ss:$8 sps:$4 sm:$0xff]  }
  0x70   :  { %797 = vmatpush1.bf16.msra.mxu0 %v1295_v44  ;;  %v1340_v44 = vld [vmem:[#allocation7 + $0x164] ss:$8 sps:$4 sm:$0xff]  }
  0x71   :  { %340 = vmatpush1.bf16.msra.mxu1 %v1251_v30  ;;  %798 = vmatprep.subr.bf16.mxu0 %v1296_v45  ;;  %v1338_v45 = vld [vmem:[#allocation7 + $0x160] ss:$8 sps:$4 sm:$0xff]  }
  0x72   :  { %341 = vmatprep.subr.bf16.mxu1 %v1256_v31  ;;  %v1320_v31 = vld [vmem:[#allocation7 + $0x100] ss:$8 sps:$4 sm:$0xff]  }
  0x74   :  { %799 = vmatpush1.bf16.msra.mxu0 %v1298_v48 }
  0x75   :  { %342 = vmatpush1.bf16.msra.mxu1 %v1254_v33  ;;  %800 = vmatprep.subr.bf16.mxu0 %v1299_v49  ;;  %v1325_v33 = vld [vmem:[#allocation7 + $0x114] ss:$8 sps:$4 sm:$0xff]  }
  0x76   :  { %343 = vmatprep.subr.bf16.mxu1 %v1259_v35  ;;  %v1328_v35 = vld [vmem:[#allocation7 + $0x124] ss:$8 sps:$4 sm:$0xff]  }
  0x78   :  { %801 = vmatpush1.bf16.msra.mxu0 %v1301_v52 }
  0x79   :  { %344 = vmatpush1.bf16.msra.mxu1 %v1257_v38  ;;  %802 = vmatprep.subr.bf16.mxu0 %v1302_v53  ;;  %v1329_v38 = vld [vmem:[#allocation7 + $0x130] ss:$8 sps:$4 sm:$0xff]   ;;  %v1346_v53 = vld [vmem:[#allocation7 + $0x184] ss:$8 sps:$4 sm:$0xff]  }
  0x7a   :  { %345 = vmatprep.subr.bf16.mxu1 %v1262_v39  ;;  %v1334_v39 = vld [vmem:[#allocation7 + $0x144] ss:$8 sps:$4 sm:$0xff]  }
  0x7c   :  { %803 = vmatpush1.bf16.msra.mxu0 %v1304_v55 }
  0x7d   :  { %346 = vmatpush1.bf16.msra.mxu1 %v1260_v42  ;;  %804 = vmatprep.subr.bf16.mxu0 %v1305_v56  ;;  %v1335_v42 = vld [vmem:[#allocation7 + $0x150] ss:$8 sps:$4 sm:$0xff]   ;;  %v1344_v56 = vld [vmem:[#allocation7 + $0x180] ss:$8 sps:$4 sm:$0xff]  }
  0x7e   :  { %347 = vmatprep.subr.bf16.mxu1 %v1265_v43  ;;  %v130_v43 = vsub.s32 3, %v1610_v16 }
  0x80   :  { %805 = vmatpush1.bf16.msra.mxu0 %v1307_v57 }
  0x81   :  { %348 = vmatpush1.bf16.msra.mxu1 %v1263_v46  ;;  %806 = vmatprep.subr.bf16.mxu0 %v1308_v58  ;;  %v131_v46 = vrot.slane %v1616_v18, %v130_v43  ;;  %v1349_v58 = vld [vmem:[#allocation7 + $0x194] ss:$8 sps:$4 sm:$0xff]  }
  0x82   :  { %349 = vmatprep.subr.bf16.mxu1 %v1268_v47  ;;  %v1343_v47 = vld [vmem:[#allocation7 + $0x174] ss:$8 sps:$4 sm:$0xff]  }
  0x84   :  { %807 = vmatpush1.bf16.msra.mxu0 %v1310_v59  ;;  %v1347_v59 = vld [vmem:[#allocation7 + $0x190] ss:$8 sps:$4 sm:$0xff]  }
  0x85   :  { %350 = vmatpush1.bf16.msra.mxu1 %v1266_v50  ;;  %808 = vmatprep.subr.bf16.mxu0 %v1311_v60  ;;  %v1341_v50 = vld [vmem:[#allocation7 + $0x170] ss:$8 sps:$4 sm:$0xff]   ;;  %v1352_v60 = vld [vmem:[#allocation7 + $0x1a4] ss:$8 sps:$4 sm:$0xff]  }
  0x86   :  { %351 = vmatprep.subr.bf16.mxu1 %v1271_v51 }
  0x88   :  { %809 = vmatpush1.bf16.msra.mxu0 %v1313_v61  ;;  %v1350_v61 = vld [vmem:[#allocation7 + $0x1a0] ss:$8 sps:$4 sm:$0xff]  }
  0x89   :  { %352 = vmatpush1.bf16.msra.mxu1 %v1269_v54  ;;  %810 = vmatprep.subr.bf16.mxu0 %v1314_v62  ;;  %v1355_v62 = vld [vmem:[#allocation7 + $0x1b4] ss:$8 sps:$4 sm:$0xff]  }
  0x8a   :  { %1184 = vmatprep.subr.bf16.mxu1 %v1368_v3  ;;  %v1361_v3 = vld [vmem:[#allocation7 + $0x1d4] ss:$8 sps:$4 sm:$0xff]  }
  0x8c   :  { %370 = vmatmul.mubr.bf16.vlgmr.msra.gmra.mrb[4].mxu1 %v1606_v24  ;;  %811 = vmatpush1.bf16.msra.mxu0 %v1316_v63  ;;  %v1353_v63 = vld [vmem:[#allocation7 + $0x1b0] ss:$8 sps:$4 sm:$0xff]  }
  0x8d   :  { %812 = vmatprep.subr.bf16.mxu0 %v1317_v0  ;;  %1185 = vmatpush3.bf16.msra.mxu1 %v1369_v4  ;;  %v1358_v0 = vld [vmem:[#allocation7 + $0x1c4] ss:$8 sps:$4 sm:$0xff]   ;;  %v1359_v4 = vld [vmem:[#allocation7 + $0x1d0] ss:$8 sps:$4 sm:$0xff]  }
  0x8e   :  { %1186 = vmatprep.subr.bf16.mxu1 %v1370_v5 }
  0x90   :  { %813 = vmatpush1.bf16.msra.mxu0 %v1319_v1  ;;  %v1356_v1 = vld [vmem:[#allocation7 + $0x1c0] ss:$8 sps:$4 sm:$0xff]  }
  0x91   :  { %823 = vmatprep.subr.bf16.mxu0 %v1322_v2  ;;  %1187 = vmatpush3.bf16.msra.mxu1 %v1371_v6  ;;  %v126_v2 = vsub.s32 2, %v1610_v16  ;;  %v1364_v6 = vld [vmem:[#allocation7 + $0x1e4] ss:$8 sps:$4 sm:$0xff]  }
  0x92   :  { %1188 = vmatprep.subr.bf16.mxu1 %v1372_v7  ;;  %v1362_v7 = vld [vmem:[#allocation7 + $0x1e0] ss:$8 sps:$4 sm:$0xff]  }
  0x93   :  { %v127_v5 = vrot.slane %v1616_v18, %v126_v2  ;;  %v1383_v18 = vld [vmem:[#allocation8 + $0x38] sm:$0xff]  }
  0x95   :  { %1189 = vmatpush3.bf16.msra.mxu1 %v1373_v8 }
  0x96   :  { %1190 = vmatprep.subr.bf16.mxu1 %v1374_v9  ;;  %v1367_v9 = vld [vmem:[#allocation7 + $0x1f4] ss:$8 sps:$4 sm:$0xff]  }
  0x99   :  { %1191 = vmatpush3.bf16.msra.mxu1 %v1375_v10  ;;  %v1365_v10 = vld [vmem:[#allocation7 + $0x1f0] ss:$8 sps:$4 sm:$0xff]  }
  0x9a   :  { %1192 = vmatprep.subr.bf16.mxu1 %v1376_v11 }
  0x9d   :  { %1193 = vmatpush3.bf16.msra.mxu1 %v1377_v12 }
  0x9e   :  { %1194 = vmatprep.subr.bf16.mxu1 %v1378_v13  ;;  %v1380_v13 = vld [vmem:[#allocation8 + $0x70] sm:$0xff]  }
  0xa1   :  { %1195 = vmatpush3.bf16.msra.mxu1 %v1379_v14  ;;  %v1381_v14 = vld [vmem:[#allocation8 + $0x30] sm:$0xff]  }
  0xa2   :  { %1196 = vmatprep.subr.bf16.mxu1 %v1380_v13 }
  0xa5   :  { %1197 = vmatpush3.bf16.msra.mxu1 %v1381_v14 }
  0xa6   :  { %1198 = vmatprep.subr.bf16.mxu1 %v1382_v15 }
  0xa9   :  { %1199 = vmatpush3.bf16.msra.mxu1 %v1383_v18 }
 0x13f   :  { %v330_v22 = vpop.f32.mrb[0].mxu1 }
 0x140   :  { %v331_v23 = vadd.f32 %v330_v22, %v119_v20  ;;  %v332_v24 = vpop.f32.mrb[1].mxu1  ;;  %v450_v20 = vld [vmem:[%s1655_s4] sm:$0x3] }
 0x141   :  { %v333_v25 = vadd.f32 %v332_v24, %v123_v21  ;;  %v334_v26 = vpop.f32.mrb[2].mxu1  ;;  %v455_v21 = vrot.slane %v450_v20, %v118_v17  ;;  %v459_v22 = vrot.slane %v450_v20, %v122_v19  ;;  %v1167_v17 = vld [vmem:[%s1657_s6] ss:$0 sm:$0xff]  ;;  %s1476_s6 = scalar_lea.vmem %s1061_s9, 128 }
 0x142   :  { %v378_v27 = vmax.f32 %v331_v23, 0.0  ;;  %v335_v28 = vpop.f32.mrb[3].mxu1  ;;  %p1477_p4 = scmp.ne.s32.totalorder %s1061_s9, %s1476_s6  ;;  %p1482_p6 = scmp.lt.s32.totalorder %s1476_s6, %s1476_s6 }
 0x143   :  { %v379_v29 = vmax.f32 %v333_v25, 0.0 }
 0x144   :  { %v382_v32 = vpack.c.bf16 %v378_v27, %v378_v27  ;;  %p1483_p7 = por %p1482_p6, %p1481_p5 }
 0x145   :  { %v383_v30 = vpack.c.bf16 %v379_v29, %v379_v29 }
 0x146   :  { %p1484_p8 = pnand %p1483_p7, %p1477_p4 }
 0x147   :  { %814 = vmatprep.mubr.bf16.mxu0 %v383_v30 }
 0x148   :  { %815 = vmatmul.mubr.bf16.vlgmr.msra.gmra.mrb[0].mxu0 %v382_v32 }
 0x149   :  { %824 = vmatpush1.bf16.msra.mxu0 %v1320_v31 }
 0x14a   :  { %825 = vmatprep.subr.bf16.mxu0 %v1325_v33 }
 0x14d   :  { %826 = vmatpush1.bf16.msra.mxu0 %v1323_v34 }
 0x14e   :  { %827 = vmatprep.subr.bf16.mxu0 %v1328_v35 }
 0x151   :  { %828 = vmatpush1.bf16.msra.mxu0 %v1326_v36 }
 0x152   :  { %829 = vmatprep.subr.bf16.mxu0 %v1331_v37 }
 0x155   :  { %830 = vmatpush1.bf16.msra.mxu0 %v1329_v38 }
 0x156   :  { %831 = vmatprep.subr.bf16.mxu0 %v1334_v39 }
 0x159   :  { %832 = vmatpush1.bf16.msra.mxu0 %v1332_v40 }
 0x15a   :  { %833 = vmatprep.subr.bf16.mxu0 %v1337_v41 }
 0x15d   :  { %834 = vmatpush1.bf16.msra.mxu0 %v1335_v42 }
 0x15e   :  { %835 = vmatprep.subr.bf16.mxu0 %v1340_v44 }
 0x15f   :  { %v371_v48 = vpop.f32.mrb[4].mxu1 }
 0x160   :  { %v373_v49 = vpop.f32.mrb[5].mxu1  ;;  %v372_v8 = vadd.f32 %v371_v48, %v127_v5 }
 0x161   :  { %836 = vmatpush1.bf16.msra.mxu0 %v1338_v45  ;;  %v374_v51 = vadd.f32 %v373_v49, %v131_v46  ;;  %v375_v52 = vpop.f32.mrb[6].mxu1 }
 0x162   :  { %837 = vmatprep.subr.bf16.mxu0 %v1343_v47  ;;  %v376_v54 = vpop.f32.mrb[7].mxu1  ;;  %v380_v11 = vmax.f32 %v372_v8, 0.0 }
 0x163   :  { %v381_v55 = vmax.f32 %v374_v51, 0.0 }
 0x164   :  { %v384_v12 = vpack.c.bf16 %v380_v11, %v380_v11 }
 0x165   :  { %838 = vmatpush1.bf16.msra.mxu0 %v1341_v50  ;;  %v385_v57 = vpack.c.bf16 %v381_v55, %v381_v55 }
 0x166   :  { %839 = vmatprep.subr.bf16.mxu0 %v1346_v53 }
 0x167   :  { %855 = vmatprep.mubr.bf16.mxu0 %v385_v57 }
 0x169   :  { %840 = vmatpush1.bf16.msra.mxu0 %v1344_v56 }
 0x16a   :  { %841 = vmatprep.subr.bf16.mxu0 %v1349_v58 }
 0x16d   :  { %842 = vmatpush1.bf16.msra.mxu0 %v1347_v59 }
 0x16e   :  { %843 = vmatprep.subr.bf16.mxu0 %v1352_v60 }
 0x171   :  { %844 = vmatpush1.bf16.msra.mxu0 %v1350_v61 }
 0x172   :  { %845 = vmatprep.subr.bf16.mxu0 %v1355_v62 }
 0x175   :  { %846 = vmatpush1.bf16.msra.mxu0 %v1353_v63 }
 0x176   :  { %847 = vmatprep.subr.bf16.mxu0 %v1358_v0 }
 0x179   :  { %848 = vmatpush1.bf16.msra.mxu0 %v1356_v1 }
 0x17a   :  { %849 = vmatprep.subr.bf16.mxu0 %v1361_v3 }
 0x17d   :  { %850 = vmatpush1.bf16.msra.mxu0 %v1359_v4 }
 0x17e   :  { %851 = vmatprep.subr.bf16.mxu0 %v1364_v6 }
 0x181   :  { %852 = vmatpush1.bf16.msra.mxu0 %v1362_v7 }
 0x182   :  { %853 = vmatprep.subr.bf16.mxu0 %v1367_v9 }
 0x185   :  { %854 = vmatpush1.bf16.msra.mxu0 %v1365_v10 }
 0x188   :  { %856 = vmatmul.mubr.bf16.vlgmr.msra.gmra.mrb[0].mxu0 %v384_v12 }
 0x25b   :  { %v857_v23 = vpop.f32.mrb[0].mxu0 }
 0x25c   :  { %v1206_v24 = vadd.f32 %v857_v23, %v455_v21  ;;  %v859_v25 = vpop.f32.mrb[1].mxu0 }
 0x25d   :  { %v1207_v26 = vadd.f32 %v859_v25, %v459_v22  ;;  %v861_v27 = vpop.f32.mrb[2].mxu0 }
 0x25e   :  { %v864_v28 = vmax.f32 %v1206_v24, 0.0  ;;  %v862_v29 = vpop.f32.mrb[3].mxu0 }
 0x25f   :  { %v865_v30 = vmax.f32 %v1207_v26, 0.0 }
 0x260   :  { %v866_v32 = vpack.c.bf16 %v864_v28, %v864_v28 }
 0x261   :  { %v867_v31 = vpack.c.bf16 %v865_v30, %v865_v30 }
 0x263   :  { %1035 = vmatprep.mubr.bf16.mxu1 %v867_v31 }
 0x264   :  { %1036 = vmatmul.mubr.bf16.vlgmr.msra.gmra.mrb[8].mxu1 %v866_v32 }
 0x337   :  { %v1200_v33 = vpop.f32.mrb[8].mxu1 }
 0x338   :  { %v1201_v34 = vpop.f32.mrb[9].mxu1 }
 0x339   :  { %v1202_v16 = vadd.f32 %v1201_v34, %v1200_v33  ;;  %v1203_v19 = vpop.f32.mrb[10].mxu1 }
 0x33a   :  { %v1204_v35 = vpop.f32.mrb[11].mxu1 }
 0x33b   :  { %v1038_v36 = vadd.f32 %v1202_v16, %v1167_v17 }
 0x33d   :  { %1043 = vmax.xlane.f32.xlu0 %v1038_v36 }
 0x3ca   :  { %v1044_v37 = vpop.xlane.xlu0 %1043 }
 0x3cb   :  { %v1045_v38 = vsub.f32 %v1038_v36, %v1044_v37 }
 0x3cd   :  { %v1046_v39 = vmul.f32 1.442695, %v1045_v38 }
 0x3cf   :  { %1384 = vpow2.f32 %v1046_v39 }
 0x3d9   :  { %v1385_v40 = vpop.eup %1384 }
 0x3da   :  { %1048 = vadd.xlane.f32.xlu0 %v1385_v40 }
 0x467   :  { %v1049_v41 = vpop.xlane.xlu0 %1048 }
 0x468   :  { %1386 = vlog2.f32 %v1049_v41 }
 0x472   :  { %v1387_v42 = vpop.eup %1386 }
 0x473   :  { %v1051_v43 = vmul.f32 0.6931472, %v1387_v42 }
 0x475   :  { %v1052_v44 = vsub.f32 %v1045_v38, %v1051_v43 }
 0x477   :  { %1053 = vst [vmem:[#allocation10] sm:$0xff] %v1052_v44 }
 0x478   :  { %1487 = shalt.err (!%p1484_p8)
}
 0x479   :  { %s1488_s12 = scalar_lea.hbm %s1658_s7, 128 }
 0x47a   :  { %p1489_p9 = scmp.ne.s32.totalorder %s1658_s7, %s1488_s12  ;;  %p1492_p10 = scmp.lt.u32.totalorder %s1488_s12, %s1658_s7 }
 0x47c   :  { %p1494_p11 = pnand %p1492_p10, %p1489_p9 }
 0x47e   :  { %1497 = shalt.err (!%p1494_p11)
}
 0x47f   :  { %1063 = dma.vmem_to_hbm [thread:$0]  %s1061_s9, 128, %s1658_s7, [#allocation4]  }
 0x480   :  { %1504 = dma.done.wait [#allocation4], 128  }
 0x481   :  { %1505 = vsyncadd [#allocation4], 4294967168 }
 0x482   :  { %1067 = vsyncpa [#allocation3], 1 }
 0x483   :  { %1068 = vsyncpa [#allocation6], 1 }
 0x484   :  { %1069 = vsyncpa [#allocation9], 1 }
 0x485   :  { %1070 = vsyncpa [#allocation4], 1 }

// kernel: tpu_custom_call.1
= control target key start
LH: loop header
LB: loop body
LE: loop exit
PB: predicated region body
PF: predicated region fallthrough
CT: control target
= control target key end

     0   :  { %12 = vsyncpa [#allocation3], 0  ;;  %s1651_s0 = inlined_call_operand.hbm [shape: bf16[8,128], index: 0, kind: input, shape index: {}]   ;;  %s1652_s1 = inlined_call_operand.hbm [shape: bf16[128,512], index: 1, kind: input, shape index: {}]   ;;  %s1653_s2 = inlined_call_operand.vmem [shape: f32[1,512], index: 2, kind: input, shape index: {}]   ;;  %s1654_s3 = inlined_call_operand.hbm [shape: bf16[512,256], index: 3, kind: input, shape index: {}]   ;;  %s1655_s4 = inlined_call_operand.vmem [shape: f32[1,256], index: 4, kind: input, shape index: {}]   ;;  %s1656_s5 = inlined_call_operand.hbm [shape: bf16[256,128], index: 5, kind: input, shape index: {}]   ;;  %s1657_s6 = inlined_call_operand.vmem [shape: f32[1,128], index: 6, kind: input, shape index: {}]   ;;  %s1658_s7 = inlined_call_operand.hbm [shape: f32[8,128], index: 7, kind: output, shape index: {}]  }
   0x1   :  { %13 = vsyncpa [#allocation6], 0 }
   0x2   :  { %14 = vsyncpa [#allocation9], 0 }
   0x3   :  { %15 = vsyncpa [#allocation4], 0  ;;  %s1506_s24 = smov [#allocation5]   ;;  %s1388_s28 = scalar_lea.hbm %s1652_s1, 4096 }
   0x4   :  { %s31_s25 = sshll.u32 %s1506_s24, 4  ;;  %p1389_p0 = scmp.ne.s32.totalorder %s1652_s1, %s1388_s28  ;;  %s32_s25 = int_to_ptr.vmem [resolvable:$true] %s31_s25 }
   0x5   :  { %p1392_p1 = scmp.lt.u32.totalorder %s1388_s28, %s1652_s1 }
   0x7   :  { %p1394_p2 = pnand %p1392_p1, %p1389_p0 }
   0x9   :  { %1397 = shalt.err (!%p1394_p2)
}
   0xa   :  { %s1398_s10 = scalar_lea.vmem %s32_s25, 4096  ;;  %p1403_p4 = scmp.lt.s32.totalorder %s32_s25, %s32_s25 }
   0xb   :  { %p1399_p3 = scmp.ne.s32.totalorder %s32_s25, %s1398_s10  ;;  %p1404_p5 = scmp.lt.s32.totalorder %s1398_s10, %s1398_s10 }
   0xd   :  { %p1405_p6 = por %p1404_p5, %p1403_p4 }
   0xf   :  { %p1406_p7 = pnand %p1405_p6, %p1399_p3 }
  0x11   :  { %1409 = shalt.err (!%p1406_p7)
}
  0x12   :  { %s1507_s11 = smov 256   ;;  %s1508_s12 = smov 16  }
  0x13   :  { %37 = dma.hbm_to_vmem [thread:$0]  %s1652_s1, 4096, %s32_s25, [#allocation6], %s1507_s11, %s1507_s11, %s1508_s12  }
  0x14   :  { %s1509_s15 = smov [#allocation2]   ;;  %s1510_s17 = smov [#allocation7]  }
  0x15   :  { %s22_s16 = sshll.u32 %s1509_s15, 4  ;;  %s45_s18 = sshll.u32 %s1510_s17, 4  ;;  %s23_s16 = int_to_ptr.vmem [resolvable:$true] %s22_s16  ;;  %s46_s18 = int_to_ptr.vmem [resolvable:$true] %s45_s18 }
  0x16   :  { %s1410_s21 = scalar_lea.hbm %s1651_s0, 64 }
  0x17   :  { %p1411_p8 = scmp.ne.s32.totalorder %s1651_s0, %s1410_s21  ;;  %p1414_p9 = scmp.lt.u32.totalorder %s1410_s21, %s1651_s0 }
  0x19   :  { %p1416_p10 = pnand %p1414_p9, %p1411_p8 }
  0x1b   :  { %1419 = shalt.err (!%p1416_p10)
}
  0x1c   :  { %s1420_s1 = scalar_lea.vmem %s23_s16, 64  ;;  %p1425_p12 = scmp.lt.s32.totalorder %s23_s16, %s23_s16 }
  0x1d   :  { %p1421_p11 = scmp.ne.s32.totalorder %s23_s16, %s1420_s1  ;;  %p1426_p13 = scmp.lt.s32.totalorder %s1420_s1, %s1420_s1 }
  0x1f   :  { %p1427_p0 = por %p1426_p13, %p1425_p12 }
  0x21   :  { %p1428_p1 = pnand %p1427_p0, %p1421_p11 }
  0x23   :  { %1431 = shalt.err (!%p1428_p1)
}
  0x24   :  { %25 = dma.hbm_to_vmem [thread:$0]  %s1651_s0, 64, %s23_s16, [#allocation3]  }
  0x25   :  { %s1432_s30 = scalar_lea.hbm %s1654_s3, 8192 }
  0x26   :  { %p1433_p2 = scmp.ne.s32.totalorder %s1654_s3, %s1432_s30  ;;  %p1436_p3 = scmp.lt.u32.totalorder %s1432_s30, %s1654_s3 }
  0x28   :  { %p1438_p4 = pnand %p1436_p3, %p1433_p2 }
  0x2a   :  { %1441 = shalt.err (!%p1438_p4)
}
  0x2b   :  { %s1442_s12 = scalar_lea.vmem %s46_s18, 8192  ;;  %p1447_p6 = scmp.lt.s32.totalorder %s46_s18, %s46_s18 }
  0x2c   :  { %p1443_p5 = scmp.ne.s32.totalorder %s46_s18, %s1442_s12  ;;  %p1448_p7 = scmp.lt.s32.totalorder %s1442_s12, %s1442_s12 }
  0x2e   :  { %p1449_p8 = por %p1448_p7, %p1447_p6 }
  0x30   :  { %p1450_p9 = pnand %p1449_p8, %p1443_p5 }
  0x32   :  { %1453 = shalt.err (!%p1450_p9)
}
  0x33   :  { %s1511_s0 = smov 128   ;;  %s1512_s13 = smov 8  }
  0x34   :  { %51 = dma.hbm_to_vmem [thread:$0]  %s1654_s3, 8192, %s46_s18, [#allocation6], %s1511_s0, %s1511_s0, %s1512_s13  }
  0x35   :  { %s1513_s16 = smov [#allocation8]   ;;  %s1454_s21 = scalar_lea.hbm %s1656_s5, 2048 }
  0x36   :  { %s59_s17 = sshll.u32 %s1513_s16, 4  ;;  %p1455_p10 = scmp.ne.s32.totalorder %s1656_s5, %s1454_s21  ;;  %s60_s17 = int_to_ptr.vmem [resolvable:$true] %s59_s17 }
  0x37   :  { %p1458_p11 = scmp.lt.u32.totalorder %s1454_s21, %s1656_s5 }
  0x39   :  { %p1460_p12 = pnand %p1458_p11, %p1455_p10 }
  0x3b   :  { %1463 = shalt.err (!%p1460_p12)
}
  0x3c   :  { %s1464_s1 = scalar_lea.vmem %s60_s17, 2048  ;;  %p1469_p0 = scmp.lt.s32.totalorder %s60_s17, %s60_s17 }
  0x3d   :  { %p1465_p13 = scmp.ne.s32.totalorder %s60_s17, %s1464_s1  ;;  %p1470_p1 = scmp.lt.s32.totalorder %s1464_s1, %s1464_s1 }
  0x3f   :  { %p1471_p2 = por %p1470_p1, %p1469_p0 }
  0x41   :  { %p1472_p3 = pnand %p1471_p2, %p1465_p13 }
  0x43   :  { %1475 = shalt.err (!%p1472_p3)
}
  0x44   :  { %s1514_s3 = smov 64   ;;  %s1515_s18 = smov 4  }
  0x45   :  { %65 = dma.hbm_to_vmem [thread:$0]  %s1656_s5, 2048, %s60_s17, [#allocation9], %s1514_s3, %s1514_s3, %s1515_s18  }
  0x46   :  { %1498 = dma.done.wait [#allocation3], 64  }
  0x47   :  { %1499 = vsyncadd [#allocation3], 4294967232 }
  0x48   :  { %1500 = dma.done.wait [#allocation6], 12288  }
  0x49   :  { %1501 = vsyncadd [#allocation6], 4294955008 }
  0x4a   :  { %1502 = dma.done.wait [#allocation9], 2048  }
  0x4b   :  { %1503 = vsyncadd [#allocation9], 4294965248  ;;  %v1516_v0 = vmov 0   ;;  %v1224_v1 = vld [vmem:[#allocation5 + $0x4] ss:$16 sps:$4 sm:$0xff]   ;;  %s1517_s8 = smov [#allocation10]  }
  0x4c   :  { %328 = vmatprep.mubr.bf16.mxu1 %v1516_v0  ;;  %v1226_v2 = vld [vmem:[#allocation5] ss:$16 sps:$4 sm:$0xff]   ;;  %296 = vmatprep.subr.bf16.mxu1 %v1224_v1  ;;  %v1227_v3 = vld [vmem:[#allocation5 + $0x24] ss:$16 sps:$4 sm:$0xff]   ;;  %v1250_v22 = vld [vmem:[#allocation5 + $0xc] ss:$16 sps:$4 sm:$0xff]  }
  0x4d   :  { %297 = vmatpush1.bf16.msra.mxu1 %v1226_v2  ;;  %v1229_v4 = vld [vmem:[#allocation5 + $0x20] ss:$16 sps:$4 sm:$0xff]   ;;  %v1230_v5 = vld [vmem:[#allocation5 + $0x44] ss:$16 sps:$4 sm:$0xff]   ;;  %v1606_v24 = vld [vmem:[#allocation2] sm:$0xf] }
  0x4e   :  { %298 = vmatprep.subr.bf16.mxu1 %v1227_v3  ;;  %v1232_v6 = vld [vmem:[#allocation5 + $0x40] ss:$16 sps:$4 sm:$0xff]   ;;  %v1233_v7 = vld [vmem:[#allocation5 + $0x64] ss:$16 sps:$4 sm:$0xff]   ;;  %v1248_v26 = vld [vmem:[#allocation5 + $0x8] ss:$16 sps:$4 sm:$0xff]  }
  0x4f   :  { %v1235_v8 = vld [vmem:[#allocation5 + $0x60] ss:$16 sps:$4 sm:$0xff]   ;;  %v1236_v9 = vld [vmem:[#allocation5 + $0x84] ss:$16 sps:$4 sm:$0xff]   ;;  %v1253_v27 = vld [vmem:[#allocation5 + $0x2c] ss:$16 sps:$4 sm:$0xff]  }
  0x50   :  { %v1238_v10 = vld [vmem:[#allocation5 + $0x80] ss:$16 sps:$4 sm:$0xff]   ;;  %v1239_v11 = vld [vmem:[#allocation5 + $0xa4] ss:$16 sps:$4 sm:$0xff]   ;;  %v1251_v30 = vld [vmem:[#allocation5 + $0x28] ss:$16 sps:$4 sm:$0xff]  }
  0x51   :  { %299 = vmatpush1.bf16.msra.mxu1 %v1229_v4  ;;  %v1241_v12 = vld [vmem:[#allocation5 + $0xa0] ss:$16 sps:$4 sm:$0xff]   ;;  %v1242_v13 = vld [vmem:[#allocation5 + $0xc4] ss:$16 sps:$4 sm:$0xff]   ;;  %v1256_v31 = vld [vmem:[#allocation5 + $0x4c] ss:$16 sps:$4 sm:$0xff]  }
  0x52   :  { %300 = vmatprep.subr.bf16.mxu1 %v1230_v5  ;;  %v1244_v14 = vld [vmem:[#allocation5 + $0xc0] ss:$16 sps:$4 sm:$0xff]   ;;  %v1272_v15 = vld [vmem:[#allocation7 + $0x4] ss:$8 sps:$4 sm:$0xff]   ;;  %v1275_v17 = vld [vmem:[#allocation7 + $0x14] ss:$8 sps:$4 sm:$0xff]  }
  0x53   :  { %v1274_v16 = vld [vmem:[#allocation7] ss:$8 sps:$4 sm:$0xff]   ;;  %v1245_v18 = vld [vmem:[#allocation5 + $0xe4] ss:$16 sps:$4 sm:$0xff]   ;;  %782 = vmatprep.subr.bf16.mxu0 %v1272_v15  ;;  %v1277_v19 = vld [vmem:[#allocation7 + $0x10] ss:$8 sps:$4 sm:$0xff]   ;;  %v116_v15 = vlaneseq }
  0x54   :  { %783 = vmatpush1.bf16.msra.mxu0 %v1274_v16  ;;  %v1278_v20 = vld [vmem:[#allocation7 + $0x24] ss:$8 sps:$4 sm:$0xff]   ;;  %v1247_v21 = vld [vmem:[#allocation5 + $0xe0] ss:$16 sps:$4 sm:$0xff]   ;;  %v1281_v25 = vld [vmem:[#allocation7 + $0x34] ss:$8 sps:$4 sm:$0xff]  }
  0x55   :  { %301 = vmatpush1.bf16.msra.mxu1 %v1232_v6  ;;  %784 = vmatprep.subr.bf16.mxu0 %v1275_v17  ;;  %v1280_v23 = vld [vmem:[#allocation7 + $0x20] ss:$8 sps:$4 sm:$0xff]   ;;  %v1283_v28 = vld [vmem:[#allocation7 + $0x30] ss:$8 sps:$4 sm:$0xff]   ;;  %v1284_v29 = vld [vmem:[#allocation7 + $0x44] ss:$8 sps:$4 sm:$0xff]  }
  0x56   :  { %302 = vmatprep.subr.bf16.mxu1 %v1233_v7  ;;  %v1286_v32 = vld [vmem:[#allocation7 + $0x40] ss:$8 sps:$4 sm:$0xff]   ;;  %v1287_v34 = vld [vmem:[#allocation7 + $0x54] ss:$8 sps:$4 sm:$0xff]   ;;  %v1289_v36 = vld [vmem:[#allocation7 + $0x50] ss:$8 sps:$4 sm:$0xff]  }
  0x57   :  { %v1254_v33 = vld [vmem:[#allocation5 + $0x48] ss:$16 sps:$4 sm:$0xff]   ;;  %v1259_v35 = vld [vmem:[#allocation5 + $0x6c] ss:$16 sps:$4 sm:$0xff]   ;;  %v1368_v3 = vld [vmem:[#allocation8 + $0x40] sm:$0xff]   ;;  %v1610_v16 = vshrl.u32 %v116_v15, 7 }
  0x58   :  { %785 = vmatpush1.bf16.msra.mxu0 %v1277_v19  ;;  %v1290_v37 = vld [vmem:[#allocation7 + $0x64] ss:$8 sps:$4 sm:$0xff]   ;;  %v1257_v38 = vld [vmem:[#allocation5 + $0x68] ss:$16 sps:$4 sm:$0xff]   ;;  %v1293_v41 = vld [vmem:[#allocation7 + $0x74] ss:$8 sps:$4 sm:$0xff]  }
  0x59   :  { %303 = vmatpush1.bf16.msra.mxu1 %v1235_v8  ;;  %786 = vmatprep.subr.bf16.mxu0 %v1278_v20  ;;  %v1262_v39 = vld [vmem:[#allocation5 + $0x8c] ss:$16 sps:$4 sm:$0xff]   ;;  %v1292_v40 = vld [vmem:[#allocation7 + $0x60] ss:$8 sps:$4 sm:$0xff]   ;;  %v1295_v44 = vld [vmem:[#allocation7 + $0x70] ss:$8 sps:$4 sm:$0xff]  }
  0x5a   :  { %304 = vmatprep.subr.bf16.mxu1 %v1236_v9  ;;  %v1260_v42 = vld [vmem:[#allocation5 + $0x88] ss:$16 sps:$4 sm:$0xff]   ;;  %v1265_v43 = vld [vmem:[#allocation5 + $0xac] ss:$16 sps:$4 sm:$0xff]   ;;  %v1369_v4 = vld [vmem:[#allocation8] sm:$0xff]   ;;  %v118_v17 = vsub.s32 0, %v1610_v16 }
  0x5b   :  { %v1296_v45 = vld [vmem:[#allocation7 + $0x84] ss:$8 sps:$4 sm:$0xff]   ;;  %v1263_v46 = vld [vmem:[#allocation5 + $0xa8] ss:$16 sps:$4 sm:$0xff]   ;;  %v1299_v49 = vld [vmem:[#allocation7 + $0x94] ss:$8 sps:$4 sm:$0xff]  }
  0x5c   :  { %787 = vmatpush1.bf16.msra.mxu0 %v1280_v23  ;;  %v1268_v47 = vld [vmem:[#allocation5 + $0xcc] ss:$16 sps:$4 sm:$0xff]   ;;  %v1298_v48 = vld [vmem:[#allocation7 + $0x80] ss:$8 sps:$4 sm:$0xff]   ;;  %v1301_v52 = vld [vmem:[#allocation7 + $0x90] ss:$8 sps:$4 sm:$0xff]  }
  0x5d   :  { %305 = vmatpush1.bf16.msra.mxu1 %v1238_v10  ;;  %788 = vmatprep.subr.bf16.mxu0 %v1281_v25  ;;  %v1266_v50 = vld [vmem:[#allocation5 + $0xc8] ss:$16 sps:$4 sm:$0xff]   ;;  %v1271_v51 = vld [vmem:[#allocation5 + $0xec] ss:$16 sps:$4 sm:$0xff]   ;;  %v1372_v7 = vld [vmem:[#allocation8 + $0x50] sm:$0xff]   ;;  %v122_v19 = vsub.s32 1, %v1610_v16 }
  0x5e   :  { %306 = vmatprep.subr.bf16.mxu1 %v1239_v11  ;;  %v1302_v53 = vld [vmem:[#allocation7 + $0xa4] ss:$8 sps:$4 sm:$0xff]   ;;  %v1269_v54 = vld [vmem:[#allocation5 + $0xe8] ss:$16 sps:$4 sm:$0xff]   ;;  %v1305_v56 = vld [vmem:[#allocation7 + $0xb4] ss:$8 sps:$4 sm:$0xff]  }
  0x5f   :  { %v1304_v55 = vld [vmem:[#allocation7 + $0xa0] ss:$8 sps:$4 sm:$0xff]   ;;  %v1307_v57 = vld [vmem:[#allocation7 + $0xb0] ss:$8 sps:$4 sm:$0xff]   ;;  %v1308_v58 = vld [vmem:[#allocation7 + $0xc4] ss:$8 sps:$4 sm:$0xff]  }
  0x60   :  { %789 = vmatpush1.bf16.msra.mxu0 %v1283_v28  ;;  %v1310_v59 = vld [vmem:[#allocation7 + $0xc0] ss:$8 sps:$4 sm:$0xff]   ;;  %v1311_v60 = vld [vmem:[#allocation7 + $0xd4] ss:$8 sps:$4 sm:$0xff]   ;;  %v1313_v61 = vld [vmem:[#allocation7 + $0xd0] ss:$8 sps:$4 sm:$0xff]  }
  0x61   :  { %307 = vmatpush1.bf16.msra.mxu1 %v1241_v12  ;;  %790 = vmatprep.subr.bf16.mxu0 %v1284_v29  ;;  %v1314_v62 = vld [vmem:[#allocation7 + $0xe4] ss:$8 sps:$4 sm:$0xff]   ;;  %v1316_v63 = vld [vmem:[#allocation7 + $0xe0] ss:$8 sps:$4 sm:$0xff]   ;;  %v1319_v1 = vld [vmem:[#allocation7 + $0xf0] ss:$8 sps:$4 sm:$0xff]  }
  0x62   :  { %308 = vmatprep.subr.bf16.mxu1 %v1242_v13  ;;  %v1322_v2 = vld [vmem:[#allocation7 + $0x104] ss:$8 sps:$4 sm:$0xff]   ;;  %v1373_v8 = vld [vmem:[#allocation8 + $0x10] sm:$0xff]   ;;  %v1374_v9 = vld [vmem:[#allocation8 + $0x58] sm:$0xff]   ;;  %s1060_s9 = sshll.u32 %s1517_s8, 4  ;;  %s1061_s9 = int_to_ptr.vmem [resolvable:$true] %s1060_s9 }
  0x63   :  { %v1370_v5 = vld [vmem:[#allocation8 + $0x48] sm:$0xff]   ;;  %v1375_v10 = vld [vmem:[#allocation8 + $0x18] sm:$0xff]   ;;  %v1376_v11 = vld [vmem:[#allocation8 + $0x60] sm:$0xff]   ;;  %p1481_p5 = scmp.lt.s32.totalorder %s1061_s9, %s1061_s9 }
  0x64   :  { %791 = vmatpush1.bf16.msra.mxu0 %v1286_v32  ;;  %v1371_v6 = vld [vmem:[#allocation8 + $0x8] sm:$0xff]   ;;  %v1377_v12 = vld [vmem:[#allocation8 + $0x20] sm:$0xff]   ;;  %v1382_v15 = vld [vmem:[#allocation8 + $0x78] sm:$0xff]  }
  0x65   :  { %309 = vmatpush1.bf16.msra.mxu1 %v1244_v14  ;;  %792 = vmatprep.subr.bf16.mxu0 %v1287_v34  ;;  %v1378_v13 = vld [vmem:[#allocation8 + $0x68] sm:$0xff]   ;;  %v1323_v34 = vld [vmem:[#allocation7 + $0x110] ss:$8 sps:$4 sm:$0xff]  }
  0x66   :  { %310 = vmatprep.subr.bf16.mxu1 %v1245_v18  ;;  %v1379_v14 = vld [vmem:[#allocation8 + $0x28] sm:$0xff]   ;;  %v1616_v18 = vld [vmem:[%s1653_s2] sm:$0xf] }
  0x67   :  { %v119_v20 = vrot.slane %v1616_v18, %v118_v17 }
  0x68   :  { %793 = vmatpush1.bf16.msra.mxu0 %v1289_v36  ;;  %v1326_v36 = vld [vmem:[#allocation7 + $0x120] ss:$8 sps:$4 sm:$0xff]  }
  0x69   :  { %311 = vmatpush1.bf16.msra.mxu1 %v1247_v21  ;;  %794 = vmatprep.subr.bf16.mxu0 %v1290_v37  ;;  %v123_v21 = vrot.slane %v1616_v18, %v122_v19  ;;  %v1331_v37 = vld [vmem:[#allocation7 + $0x134] ss:$8 sps:$4 sm:$0xff]  }
  0x6a   :  { %337 = vmatprep.subr.bf16.mxu1 %v1250_v22 }
  0x6c   :  { %329 = vmatmul.mubr.bf16.vlgmr.msra.gmra.mrb[0].mxu1 %v1606_v24  ;;  %795 = vmatpush1.bf16.msra.mxu0 %v1292_v40  ;;  %v1332_v40 = vld [vmem:[#allocation7 + $0x140] ss:$8 sps:$4 sm:$0xff]  }
  0x6d   :  { %338 = vmatpush1.bf16.msra.mxu1 %v1248_v26  ;;  %369 = vmatprep.mubr.bf16.mxu1 %v1516_v0  ;;  %v1317_v0 = vld [vmem:[#allocation7 + $0xf4] ss:$8 sps:$4 sm:$0xff]  }
  0x6e   :  { %339 = vmatprep.subr.bf16.mxu1 %v1253_v27  ;;  %796 = vmatprep.subr.bf16.mxu0 %v1293_v41  ;;  %v1337_v41 = vld [vmem:[#allocation7 + $0x154] ss:$8 sps:$4 sm:$0xff]  }
  0x70   :  { %797 = vmatpush1.bf16.msra.mxu0 %v1295_v44  ;;  %v1340_v44 = vld [vmem:[#allocation7 + $0x164] ss:$8 sps:$4 sm:$0xff]  }
  0x71   :  { %340 = vmatpush1.bf16.msra.mxu1 %v1251_v30  ;;  %798 = vmatprep.subr.bf16.mxu0 %v1296_v45  ;;  %v1338_v45 = vld [vmem:[#allocation7 + $0x160] ss:$8 sps:$4 sm:$0xff]  }
  0x72   :  { %341 = vmatprep.subr.bf16.mxu1 %v1256_v31  ;;  %v1320_v31 = vld [vmem:[#allocation7 + $0x100] ss:$8 sps:$4 sm:$0xff]  }
  0x74   :  { %799 = vmatpush1.bf16.msra.mxu0 %v1298_v48 }
  0x75   :  { %342 = vmatpush1.bf16.msra.mxu1 %v1254_v33  ;;  %800 = vmatprep.subr.bf16.mxu0 %v1299_v49  ;;  %v1325_v33 = vld [vmem:[#allocation7 + $0x114] ss:$8 sps:$4 sm:$0xff]  }
  0x76   :  { %343 = vmatprep.subr.bf16.mxu1 %v1259_v35  ;;  %v1328_v35 = vld [vmem:[#allocation7 + $0x124] ss:$8 sps:$4 sm:$0xff]  }
  0x78   :  { %801 = vmatpush1.bf16.msra.mxu0 %v1301_v52 }
  0x79   :  { %344 = vmatpush1.bf16.msra.mxu1 %v1257_v38  ;;  %802 = vmatprep.subr.bf16.mxu0 %v1302_v53  ;;  %v1329_v38 = vld [vmem:[#allocation7 + $0x130] ss:$8 sps:$4 sm:$0xff]   ;;  %v1346_v53 = vld [vmem:[#allocation7 + $0x184] ss:$8 sps:$4 sm:$0xff]  }
  0x7a   :  { %345 = vmatprep.subr.bf16.mxu1 %v1262_v39  ;;  %v1334_v39 = vld [vmem:[#allocation7 + $0x144] ss:$8 sps:$4 sm:$0xff]  }
  0x7c   :  { %803 = vmatpush1.bf16.msra.mxu0 %v1304_v55 }
  0x7d   :  { %346 = vmatpush1.bf16.msra.mxu1 %v1260_v42  ;;  %804 = vmatprep.subr.bf16.mxu0 %v1305_v56  ;;  %v1335_v42 = vld [vmem:[#allocation7 + $0x150] ss:$8 sps:$4 sm:$0xff]   ;;  %v1344_v56 = vld [vmem:[#allocation7 + $0x180] ss:$8 sps:$4 sm:$0xff]  }
  0x7e   :  { %347 = vmatprep.subr.bf16.mxu1 %v1265_v43  ;;  %v130_v43 = vsub.s32 3, %v1610_v16 }
  0x80   :  { %805 = vmatpush1.bf16.msra.mxu0 %v1307_v57 }
  0x81   :  { %348 = vmatpush1.bf16.msra.mxu1 %v1263_v46  ;;  %806 = vmatprep.subr.bf16.mxu0 %v1308_v58  ;;  %v131_v46 = vrot.slane %v1616_v18, %v130_v43  ;;  %v1349_v58 = vld [vmem:[#allocation7 + $0x194] ss:$8 sps:$4 sm:$0xff]  }
  0x82   :  { %349 = vmatprep.subr.bf16.mxu1 %v1268_v47  ;;  %v1343_v47 = vld [vmem:[#allocation7 + $0x174] ss:$8 sps:$4 sm:$0xff]  }
  0x84   :  { %807 = vmatpush1.bf16.msra.mxu0 %v1310_v59  ;;  %v1347_v59 = vld [vmem:[#allocation7 + $0x190] ss:$8 sps:$4 sm:$0xff]  }
  0x85   :  { %350 = vmatpush1.bf16.msra.mxu1 %v1266_v50  ;;  %808 = vmatprep.subr.bf16.mxu0 %v1311_v60  ;;  %v1341_v50 = vld [vmem:[#allocation7 + $0x170] ss:$8 sps:$4 sm:$0xff]   ;;  %v1352_v60 = vld [vmem:[#allocation7 + $0x1a4] ss:$8 sps:$4 sm:$0xff]  }
  0x86   :  { %351 = vmatprep.subr.bf16.mxu1 %v1271_v51 }
  0x88   :  { %809 = vmatpush1.bf16.msra.mxu0 %v1313_v61  ;;  %v1350_v61 = vld [vmem:[#allocation7 + $0x1a0] ss:$8 sps:$4 sm:$0xff]  }
  0x89   :  { %352 = vmatpush1.bf16.msra.mxu1 %v1269_v54  ;;  %810 = vmatprep.subr.bf16.mxu0 %v1314_v62  ;;  %v1355_v62 = vld [vmem:[#allocation7 + $0x1b4] ss:$8 sps:$4 sm:$0xff]  }
  0x8a   :  { %1184 = vmatprep.subr.bf16.mxu1 %v1368_v3  ;;  %v1361_v3 = vld [vmem:[#allocation7 + $0x1d4] ss:$8 sps:$4 sm:$0xff]  }
  0x8c   :  { %370 = vmatmul.mubr.bf16.vlgmr.msra.gmra.mrb[4].mxu1 %v1606_v24  ;;  %811 = vmatpush1.bf16.msra.mxu0 %v1316_v63  ;;  %v1353_v63 = vld [vmem:[#allocation7 + $0x1b0] ss:$8 sps:$4 sm:$0xff]  }
  0x8d   :  { %812 = vmatprep.subr.bf16.mxu0 %v1317_v0  ;;  %1185 = vmatpush3.bf16.msra.mxu1 %v1369_v4  ;;  %v1358_v0 = vld [vmem:[#allocation7 + $0x1c4] ss:$8 sps:$4 sm:$0xff]   ;;  %v1359_v4 = vld [vmem:[#allocation7 + $0x1d0] ss:$8 sps:$4 sm:$0xff]  }
  0x8e   :  { %1186 = vmatprep.subr.bf16.mxu1 %v1370_v5 }
  0x90   :  { %813 = vmatpush1.bf16.msra.mxu0 %v1319_v1  ;;  %v1356_v1 = vld [vmem:[#allocation7 + $0x1c0] ss:$8 sps:$4 sm:$0xff]  }
  0x91   :  { %823 = vmatprep.subr.bf16.mxu0 %v1322_v2  ;;  %1187 = vmatpush3.bf16.msra.mxu1 %v1371_v6  ;;  %v126_v2 = vsub.s32 2, %v1610_v16  ;;  %v1364_v6 = vld [vmem:[#allocation7 + $0x1e4] ss:$8 sps:$4 sm:$0xff]  }
  0x92   :  { %1188 = vmatprep.subr.bf16.mxu1 %v1372_v7  ;;  %v1362_v7 = vld [vmem:[#allocation7 + $0x1e0] ss:$8 sps:$4 sm:$0xff]  }
  0x93   :  { %v127_v5 = vrot.slane %v1616_v18, %v126_v2  ;;  %v1383_v18 = vld [vmem:[#allocation8 + $0x38] sm:$0xff]  }
  0x95   :  { %1189 = vmatpush3.bf16.msra.mxu1 %v1373_v8 }
  0x96   :  { %1190 = vmatprep.subr.bf16.mxu1 %v1374_v9  ;;  %v1367_v9 = vld [vmem:[#allocation7 + $0x1f4] ss:$8 sps:$4 sm:$0xff]  }
  0x99   :  { %1191 = vmatpush3.bf16.msra.mxu1 %v1375_v10  ;;  %v1365_v10 = vld [vmem:[#allocation7 + $0x1f0] ss:$8 sps:$4 sm:$0xff]  }
  0x9a   :  { %1192 = vmatprep.subr.bf16.mxu1 %v1376_v11 }
  0x9d   :  { %1193 = vmatpush3.bf16.msra.mxu1 %v1377_v12 }
  0x9e   :  { %1194 = vmatprep.subr.bf16.mxu1 %v1378_v13  ;;  %v1380_v13 = vld [vmem:[#allocation8 + $0x70] sm:$0xff]  }
  0xa1   :  { %1195 = vmatpush3.bf16.msra.mxu1 %v1379_v14  ;;  %v1381_v14 = vld [vmem:[#allocation8 + $0x30] sm:$0xff]  }
  0xa2   :  { %1196 = vmatprep.subr.bf16.mxu1 %v1380_v13 }
  0xa5   :  { %1197 = vmatpush3.bf16.msra.mxu1 %v1381_v14 }
  0xa6   :  { %1198 = vmatprep.subr.bf16.mxu1 %v1382_v15 }
  0xa9   :  { %1199 = vmatpush3.bf16.msra.mxu1 %v1383_v18 }
 0x13f   :  { %v330_v22 = vpop.f32.mrb[0].mxu1 }
 0x140   :  { %v331_v23 = vadd.f32 %v330_v22, %v119_v20  ;;  %v332_v24 = vpop.f32.mrb[1].mxu1  ;;  %v450_v20 = vld [vmem:[%s1655_s4] sm:$0x3] }
 0x141   :  { %v333_v25 = vadd.f32 %v332_v24, %v123_v21  ;;  %v334_v26 = vpop.f32.mrb[2].mxu1  ;;  %v455_v21 = vrot.slane %v450_v20, %v118_v17  ;;  %v459_v22 = vrot.slane %v450_v20, %v122_v19  ;;  %v1167_v17 = vld [vmem:[%s1657_s6] ss:$0 sm:$0xff]  ;;  %s1476_s6 = scalar_lea.vmem %s1061_s9, 128 }
 0x142   :  { %v378_v27 = vmax.f32 %v331_v23, 0.0  ;;  %v335_v28 = vpop.f32.mrb[3].mxu1  ;;  %p1477_p4 = scmp.ne.s32.totalorder %s1061_s9, %s1476_s6  ;;  %p1482_p6 = scmp.lt.s32.totalorder %s1476_s6, %s1476_s6 }
 0x143   :  { %v379_v29 = vmax.f32 %v333_v25, 0.0 }
 0x144   :  { %v382_v32 = vpack.c.bf16 %v378_v27, %v378_v27  ;;  %p1483_p7 = por %p1482_p6, %p1481_p5 }
 0x145   :  { %v383_v30 = vpack.c.bf16 %v379_v29, %v379_v29 }
 0x146   :  { %p1484_p8 = pnand %p1483_p7, %p1477_p4 }
 0x147   :  { %814 = vmatprep.mubr.bf16.mxu0 %v383_v30 }
 0x148   :  { %815 = vmatmul.mubr.bf16.vlgmr.msra.gmra.mrb[0].mxu0 %v382_v32 }
 0x149   :  { %824 = vmatpush1.bf16.msra.mxu0 %v1320_v31 }
 0x14a   :  { %825 = vmatprep.subr.bf16.mxu0 %v1325_v33 }
 0x14d   :  { %826 = vmatpush1.bf16.msra.mxu0 %v1323_v34 }
 0x14e   :  { %827 = vmatprep.subr.bf16.mxu0 %v1328_v35 }
 0x151   :  { %828 = vmatpush1.bf16.msra.mxu0 %v1326_v36 }
 0x152   :  { %829 = vmatprep.subr.bf16.mxu0 %v1331_v37 }
 0x155   :  { %830 = vmatpush1.bf16.msra.mxu0 %v1329_v38 }
 0x156   :  { %831 = vmatprep.subr.bf16.mxu0 %v1334_v39 }
 0x159   :  { %832 = vmatpush1.bf16.msra.mxu0 %v1332_v40 }
 0x15a   :  { %833 = vmatprep.subr.bf16.mxu0 %v1337_v41 }
 0x15d   :  { %834 = vmatpush1.bf16.msra.mxu0 %v1335_v42 }
 0x15e   :  { %835 = vmatprep.subr.bf16.mxu0 %v1340_v44 }
 0x15f   :  { %v371_v48 = vpop.f32.mrb[4].mxu1 }
 0x160   :  { %v373_v49 = vpop.f32.mrb[5].mxu1  ;;  %v372_v8 = vadd.f32 %v371_v48, %v127_v5 }
 0x161   :  { %836 = vmatpush1.bf16.msra.mxu0 %v1338_v45  ;;  %v374_v51 = vadd.f32 %v373_v49, %v131_v46  ;;  %v375_v52 = vpop.f32.mrb[6].mxu1 }
 0x162   :  { %837 = vmatprep.subr.bf16.mxu0 %v1343_v47  ;;  %v376_v54 = vpop.f32.mrb[7].mxu1  ;;  %v380_v11 = vmax.f32 %v372_v8, 0.0 }
 0x163   :  { %v381_v55 = vmax.f32 %v374_v51, 0.0 }
 0x164   :  { %v384_v12 = vpack.c.bf16 %v380_v11, %v380_v11 }
 0x165   :  { %838 = vmatpush1.bf16.msra.mxu0 %v1341_v50  ;;  %v385_v57 = vpack.c.bf16 %v381_v55, %v381_v55 }
 0x166   :  { %839 = vmatprep.subr.bf16.mxu0 %v1346_v53 }
 0x167   :  { %855 = vmatprep.mubr.bf16.mxu0 %v385_v57 }
 0x169   :  { %840 = vmatpush1.bf16.msra.mxu0 %v1344_v56 }
 0x16a   :  { %841 = vmatprep.subr.bf16.mxu0 %v1349_v58 }
 0x16d   :  { %842 = vmatpush1.bf16.msra.mxu0 %v1347_v59 }
 0x16e   :  { %843 = vmatprep.subr.bf16.mxu0 %v1352_v60 }
 0x171   :  { %844 = vmatpush1.bf16.msra.mxu0 %v1350_v61 }
 0x172   :  { %845 = vmatprep.subr.bf16.mxu0 %v1355_v62 }
 0x175   :  { %846 = vmatpush1.bf16.msra.mxu0 %v1353_v63 }
 0x176   :  { %847 = vmatprep.subr.bf16.mxu0 %v1358_v0 }
 0x179   :  { %848 = vmatpush1.bf16.msra.mxu0 %v1356_v1 }
 0x17a   :  { %849 = vmatprep.subr.bf16.mxu0 %v1361_v3 }
 0x17d   :  { %850 = vmatpush1.bf16.msra.mxu0 %v1359_v4 }
 0x17e   :  { %851 = vmatprep.subr.bf16.mxu0 %v1364_v6 }
 0x181   :  { %852 = vmatpush1.bf16.msra.mxu0 %v1362_v7 }
 0x182   :  { %853 = vmatprep.subr.bf16.mxu0 %v1367_v9 }
 0x185   :  { %854 = vmatpush1.bf16.msra.mxu0 %v1365_v10 }
 0x188   :  { %856 = vmatmul.mubr.bf16.vlgmr.msra.gmra.mrb[0].mxu0 %v384_v12 }
 0x25b   :  { %v857_v23 = vpop.f32.mrb[0].mxu0 }
 0x25c   :  { %v1206_v24 = vadd.f32 %v857_v23, %v455_v21  ;;  %v859_v25 = vpop.f32.mrb[1].mxu0 }
 0x25d   :  { %v1207_v26 = vadd.f32 %v859_v25, %v459_v22  ;;  %v861_v27 = vpop.f32.mrb[2].mxu0 }
 0x25e   :  { %v864_v28 = vmax.f32 %v1206_v24, 0.0  ;;  %v862_v29 = vpop.f32.mrb[3].mxu0 }
 0x25f   :  { %v865_v30 = vmax.f32 %v1207_v26, 0.0 }
 0x260   :  { %v866_v32 = vpack.c.bf16 %v864_v28, %v864_v28 }
 0x261   :  { %v867_v31 = vpack.c.bf16 %v865_v30, %v865_v30 }
 0x263   :  { %1035 = vmatprep.mubr.bf16.mxu1 %v867_v31 }
 0x264   :  { %1036 = vmatmul.mubr.bf16.vlgmr.msra.gmra.mrb[8].mxu1 %v866_v32 }
 0x337   :  { %v1200_v33 = vpop.f32.mrb[8].mxu1 }
 0x338   :  { %v1201_v34 = vpop.f32.mrb[9].mxu1 }
 0x339   :  { %v1202_v16 = vadd.f32 %v1201_v34, %v1200_v33  ;;  %v1203_v19 = vpop.f32.mrb[10].mxu1 }
 0x33a   :  { %v1204_v35 = vpop.f32.mrb[11].mxu1 }
 0x33b   :  { %v1038_v36 = vadd.f32 %v1202_v16, %v1167_v17 }
 0x33d   :  { %1043 = vmax.xlane.f32.xlu0 %v1038_v36 }
 0x3ca   :  { %v1044_v37 = vpop.xlane.xlu0 %1043 }
 0x3cb   :  { %v1045_v38 = vsub.f32 %v1038_v36, %v1044_v37 }
 0x3cd   :  { %v1046_v39 = vmul.f32 1.442695, %v1045_v38 }
 0x3cf   :  { %1384 = vpow2.f32 %v1046_v39 }
 0x3d9   :  { %v1385_v40 = vpop.eup %1384 }
 0x3da   :  { %1048 = vadd.xlane.f32.xlu0 %v1385_v40 }
 0x467   :  { %v1049_v41 = vpop.xlane.xlu0 %1048 }
 0x468   :  { %1386 = vlog2.f32 %v1049_v41 }
 0x472   :  { %v1387_v42 = vpop.eup %1386 }
 0x473   :  { %v1051_v43 = vmul.f32 0.6931472, %v1387_v42 }
 0x475   :  { %v1052_v44 = vsub.f32 %v1045_v38, %v1051_v43 }
 0x477   :  { %1053 = vst [vmem:[#allocation10] sm:$0xff] %v1052_v44 }
 0x478   :  { %1487 = shalt.err (!%p1484_p8)
}
 0x479   :  { %s1488_s12 = scalar_lea.hbm %s1658_s7, 128 }
 0x47a   :  { %p1489_p9 = scmp.ne.s32.totalorder %s1658_s7, %s1488_s12  ;;  %p1492_p10 = scmp.lt.u32.totalorder %s1488_s12, %s1658_s7 }
 0x47c   :  { %p1494_p11 = pnand %p1492_p10, %p1489_p9 }
 0x47e   :  { %1497 = shalt.err (!%p1494_p11)
}
 0x47f   :  { %1063 = dma.vmem_to_hbm [thread:$0]  %s1061_s9, 128, %s1658_s7, [#allocation4]  }
 0x480   :  { %1504 = dma.done.wait [#allocation4], 128  }
 0x481   :  { %1505 = vsyncadd [#allocation4], 4294967168 }
 0x482   :  { %1067 = vsyncpa [#allocation3], 1 }
 0x483   :  { %1068 = vsyncpa [#allocation6], 1 }
 0x484   :  { %1069 = vsyncpa [#allocation9], 1 }
 0x485   :  { %1070 = vsyncpa [#allocation4], 1 }

</bundles_post_ra>
